<compile_context>
chip_gen: v7x
topology: tpu7x:2x2x1
jax: 0.10.0
libtpu: 0.0.40
codegen_flags: <defaults>
</compile_context>

<pallas_src>
import functools

import jax
import jax.numpy as jnp
from jax import lax
from jax.experimental import pallas as pl
from jax.experimental.pallas import tpu as pltpu


# -------------------- small helpers --------------------

def _round_up(x, m):
    return ((x + m - 1) // m) * m


def _pick_tile(n, target, align):
    """Tile for a dim of extent n: the full dim when it fits `target` (always a
    legal block), else the largest multiple of `align` <= target dividing n (so
    the big operand never needs padding / an HBM copy), else `target`
    (caller pads as a rare fallback)."""
    if n <= target:
        return n
    best = None
    for cand in range(align, target + 1, align):
        if n % cand == 0:
            best = cand
    return best if best is not None else target


# -------------------- fused activation + matmul (MXU) --------------------

def _matmul_act_kernel(a_ref, b_ref, o_ref, acc_ref, *, slope):
    """One (phase, i, j) output tile; accumulates over the K grid axis (axis 3).

    The activation is applied to the im2col patch matrix inside the kernel
    (valid because LeakyReLU/ReLU fix 0, so zero-padded patch entries stay 0);
    operands hit the MXU as bf16 with an f32 VMEM accumulator."""
    @pl.when(pl.program_id(3) == 0)
    def _():
        acc_ref[...] = jnp.zeros_like(acc_ref)

    a = a_ref[0].astype(jnp.float32)
    a = jnp.where(a >= 0, a, a * slope)          # slope: 0.2 LeakyReLU, 0.0 ReLU
    acc_ref[...] += jnp.dot(a.astype(jnp.bfloat16), b_ref[0],
                            preferred_element_type=jnp.float32)

    @pl.when(pl.program_id(3) == pl.num_programs(3) - 1)
    def _():
        o_ref[0] = acc_ref[...].astype(o_ref.dtype)


def matmul_act(a, b, slope, *, out_dtype=jnp.float32,
               tm_target=512, tn_target=256, tk_target=2048):
    """out[p] = act(a[p]) @ b[p]   (a: (P, M, K) bf16, b: (P, K, N) bf16).

    Tiled over M, N, K; K is the innermost ("arbitrary") grid axis with an f32
    accumulator. N is padded up to a lane-dense multiple of 128 (unmasked
    stores); that pad is stripped afterwards (cheap -- weights/outputs are far
    smaller than the im2col matrix, which is never padded). Worst-case VMEM
    working set (~8 MiB at tm=512, tk=2048, tn=256, bf16 inputs, double
    buffered) fits the default scoped-VMEM limit on v5e/v6e/v7x."""
    P, M, K = a.shape
    Pb, Kb, N = b.shape
    assert (P, K) == (Pb, Kb), (a.shape, b.shape)
    b = b.astype(jnp.bfloat16)

    tm = _pick_tile(M, tm_target, 16)            # 16: bf16 sublane packing
    tk = _pick_tile(K, tk_target, 128)
    tn = 128 if N < 128 else _pick_tile(N, tn_target, 128)
    Mp, Kp, Np = _round_up(M, tm), _round_up(K, tk), _round_up(N, tn)

    if (Mp, Kp) != (M, K):                       # rare fallback; zeros are inert
        a = jnp.pad(a, ((0, 0), (0, Mp - M), (0, Kp - K)))
    if (Kp, Np) != (K, N):
        b = jnp.pad(b, ((0, 0), (0, Kp - K), (0, Np - N)))

    out = pl.pallas_call(
        functools.partial(_matmul_act_kernel, slope=slope),
        out_shape=jax.ShapeDtypeStruct((P, Mp, Np), out_dtype),
        grid_spec=pltpu.PrefetchScalarGridSpec(
            num_scalar_prefetch=0,
            grid=(P, Mp // tm, Np // tn, Kp // tk),
            in_specs=[
                pl.BlockSpec((1, tm, tk), lambda p, i, j, k: (p, i, k)),
                pl.BlockSpec((1, tk, tn), lambda p, i, j, k: (p, k, j)),
            ],
            out_specs=pl.BlockSpec((1, tm, tn), lambda p, i, j, k: (p, i, j)),
            scratch_shapes=[pltpu.VMEM((tm, tn), jnp.float32)],
        ),
        compiler_params=pltpu.CompilerParams(
            dimension_semantics=("parallel", "parallel", "parallel", "arbitrary")),
    )(a, b)

    if (Mp, Np) != (M, N):
        out = out[:, :M, :N]
    return out


# -------------------- BatchNorm2d (training stats), tiled two-pass --------------------

def _bn_stats_kernel(y_ref, s1_ref, s2_ref):
    @pl.when(pl.program_id(0) == 0)
    def _():
        s1_ref[...] = jnp.zeros_like(s1_ref)
        s2_ref[...] = jnp.zeros_like(s2_ref)
    y = y_ref[...]
    s1_ref[...] += jnp.sum(y, axis=0, keepdims=True)
    s2_ref[...] += jnp.sum(y * y, axis=0, keepdims=True)


def bn_stats(y2d, *, tile_target=1024):
    """Streaming per-channel (sum, sum_sq) over row tiles of y2d (M, C)."""
    M, C = y2d.shape
    tm = _pick_tile(M, tile_target, 8)
    Mp = _round_up(M, tm)
    if Mp != M:
        y2d = jnp.pad(y2d, ((0, Mp - M), (0, 0)))   # zero rows add 0 to both sums
    s1, s2 = pl.pallas_call(
        _bn_stats_kernel,
        out_shape=(jax.ShapeDtypeStruct((1, C), jnp.float32),
                   jax.ShapeDtypeStruct((1, C), jnp.float32)),
        grid=(Mp // tm,),
        in_specs=[pl.BlockSpec((tm, C), lambda i: (i, 0))],
        out_specs=(pl.BlockSpec((1, C), lambda i: (0, 0)),
                   pl.BlockSpec((1, C), lambda i: (0, 0))),
        compiler_params=pltpu.CompilerParams(dimension_semantics=("arbitrary",)),
    )(y2d)
    return s1[0], s2[0]


def _bn_apply_kernel(y_ref, scale_ref, shift_ref, o_ref):
    o_ref[...] = y_ref[...] * scale_ref[...] + shift_ref[...]


def bn_apply(y2d, scale, shift, *, tile_target=1024):
    """Tiled y * scale + shift (scale/shift already fold mean/var/gamma/beta)."""
    M, C = y2d.shape
    tm = _pick_tile(M, tile_target, 8)
    Mp = _round_up(M, tm)
    padded = Mp != M
    if padded:
        y2d = jnp.pad(y2d, ((0, Mp - M), (0, 0)))
    out = pl.pallas_call(
        _bn_apply_kernel,
        out_shape=jax.ShapeDtypeStruct((Mp, C), jnp.float32),
        grid=(Mp // tm,),
        in_specs=[pl.BlockSpec((tm, C), lambda i: (i, 0)),
                  pl.BlockSpec((1, C), lambda i: (0, 0)),
                  pl.BlockSpec((1, C), lambda i: (0, 0))],
        out_specs=pl.BlockSpec((tm, C), lambda i: (i, 0)),
        compiler_params=pltpu.CompilerParams(dimension_semantics=("parallel",)),
    )(y2d, scale.reshape(1, C), shift.reshape(1, C))
    return out[:M] if padded else out


# -------------------- JAX glue: im2col + weight packing --------------------

def _im2col_down(x):
    """(N, H, W, C) -> (N*Ho*Wo, 16*C) patches for k=4, stride=2, pad=1.
    Flatten order (kh, kw, c) matches prepare_params()'s w_down_mat."""
    N, H, W, C = x.shape
    Ho, Wo = H // 2, W // 2
    xp = jnp.pad(x, ((0, 0), (1, 1), (1, 1), (0, 0)))
    taps = []
    for kh in range(4):
        for kw in range(4):
            taps.append(xp[:, kh:kh + 2 * Ho - 1:2, kw:kw + 2 * Wo - 1:2, :])
    return jnp.stack(taps, axis=3).reshape(N * Ho * Wo, 16 * C)


def _im2col_phases(h):
    """(N, Ho, Wo, Cm) -> (4, N*Ho*Wo, 4*Cm) patches for the 4 output-parity
    phases of ConvTranspose2d(k=4, s=2, p=1). Only the non-zero taps are
    gathered (no zero insertion) -> 4x less data and 4x fewer MXU FLOPs than
    the naive lowering. Phase order (ph, pw); per-phase tap flatten order
    (dh, dw, c) matches prepare_params()'s w_up_phases."""
    N, Ho, Wo, Cm = h.shape
    hp = jnp.pad(h, ((0, 0), (1, 1), (1, 1), (0, 0)))
    phases = []
    for ph in range(2):
        for pw in range(2):
            taps = []
            for dh in range(2):
                for dw in range(2):
                    taps.append(hp[:, ph + dh:ph + dh + Ho, pw + dw:pw + dw + Wo, :])
            phases.append(jnp.stack(taps, axis=3).reshape(N * Ho * Wo, 4 * Cm))
    return jnp.stack(phases, axis=0)


def init_params(key, input_nc, inner_nc, outer_nc):
    k1, k2 = jax.random.split(key)
    # Conv2d weight (out=inner, in=input, kh, kw); bias=False (BatchNorm).
    w_down = 0.05 * jax.random.normal(k1, (inner_nc, input_nc, 4, 4), jnp.float32)
    # ConvTranspose2d weight (in=inner, out=outer, kh, kw); bias=False.
    w_up = 0.05 * jax.random.normal(k2, (inner_nc, outer_nc, 4, 4), jnp.float32)
    gamma = jnp.ones((outer_nc,), jnp.float32)       # BatchNorm2d default init
    beta = jnp.zeros((outer_nc,), jnp.float32)
    return dict(w_down=w_down, w_up=w_up, gamma=gamma, beta=beta)


# output parity -> ConvTranspose kernel tap index used at window position (0, 1)
_PHASE_TAPS = ((3, 1), (2, 0))


def prepare_params(params):
    """One-time (hoisted) weight packing: im2col matrix layouts + bf16 cast."""
    w_down, w_up = params['w_down'], params['w_up']
    inner_nc, input_nc = w_down.shape[0], w_down.shape[1]
    outer_nc = w_up.shape[1]

    # Down conv as a (kh, kw, ci)-flattened x inner_nc matrix.
    w_down_mat = (jnp.transpose(w_down, (2, 3, 1, 0))
                  .reshape(16 * input_nc, inner_nc).astype(jnp.bfloat16))

    # ConvTranspose as 4 output-parity phases, each a 2x2 stride-1 sub-conv.
    phases = []
    for ph in range(2):
        for pw in range(2):
            taps = []
            for dh in range(2):
                for dw in range(2):
                    taps.append(w_up[:, :, _PHASE_TAPS[ph][dh], _PHASE_TAPS[pw][dw]])
            phases.append(jnp.stack(taps, axis=0).reshape(4 * inner_nc, outer_nc))
    w_up_phases = jnp.stack(phases, axis=0).astype(jnp.bfloat16)   # (4, 4*inner, outer)

    return dict(w_down_mat=w_down_mat, w_up_phases=w_up_phases,
                gamma=params['gamma'], beta=params['beta'])


# -------------------- forward --------------------

def unet_innermost_block(prep, x_nchw):
    """Innermost UnetSkipConnectionBlock forward: cat([x, up(down(x))], dim=1)."""
    N, Ci, H, W = x_nchw.shape
    x_nhwc = jnp.transpose(x_nchw, (0, 2, 3, 1)).astype(jnp.float32)
    x_bf = x_nhwc.astype(jnp.bfloat16)       # bf16 halves im2col HBM traffic

    # ---- down: LeakyReLU(0.2) -> Conv2d(k=4, s=2, p=1), fused in the MXU kernel ----
    Ho, Wo = H // 2, W // 2
    inner_nc = prep['w_down_mat'].shape[1]
    a_d = _im2col_down(x_bf)                                      # (N*Ho*Wo, 16*Ci)
    h = matmul_act(a_d[None], prep['w_down_mat'][None], slope=0.2,
                   out_dtype=jnp.bfloat16)[0]                     # (N*Ho*Wo, inner)
    h = h.reshape(N, Ho, Wo, inner_nc)

    # ---- up: ReLU -> ConvTranspose2d(k=4, s=2, p=1) as 4 output-parity phases ----
    outer_nc = prep['w_up_phases'].shape[2]
    a_u = _im2col_phases(h)                                       # (4, N*Ho*Wo, 4*inner)
    y_ph = matmul_act(a_u, prep['w_up_phases'], slope=0.0,
                      out_dtype=jnp.float32)                      # (4, N*Ho*Wo, outer)
    y = (y_ph.reshape(2, 2, N, Ho, Wo, outer_nc)
             .transpose(2, 3, 0, 4, 1, 5)
             .reshape(N, H, W, outer_nc))

    # ---- BatchNorm2d (training batch stats), tiled two-pass ----
    M = N * H * W
    y2d = y.reshape(M, outer_nc)
    s1, s2 = bn_stats(y2d)
    mean = s1 / M
    var = jnp.maximum(s2 / M - mean * mean, 0.0)                  # biased variance
    scale = prep['gamma'] * lax.rsqrt(var + 1e-5)
    shift = prep['beta'] - mean * scale
    y_norm = bn_apply(y2d, scale, shift).reshape(N, H, W, outer_nc)

    # ---- skip connection: torch.cat([x, model(x)], dim=1) ----
    # (channel concat + NHWC->NCHW transpose left to a single XLA fusion)
    out = jnp.concatenate([x_nhwc, y_norm], axis=-1)
    return jnp.transpose(out, (0, 3, 1, 2))


# -------------------- pure-JAX reference (mirrors the kernel's bf16 math) --------------------

def _act_bf16(x_bf, slope):
    x32 = x_bf.astype(jnp.float32)
    return jnp.where(x32 >= 0, x32, slope * x32).astype(jnp.bfloat16)


def reference(params, x_nchw):
    xf = x_nchw.astype(jnp.float32)
    xl = _act_bf16(xf.astype(jnp.bfloat16), 0.2)
    h = lax.conv_general_dilated(xl, params['w_down'].astype(jnp.bfloat16),
                                 (2, 2), [(1, 1), (1, 1)],
                                 dimension_numbers=('NCHW', 'OIHW', 'NCHW'),
                                 preferred_element_type=jnp.float32)
    hr = _act_bf16(h.astype(jnp.bfloat16), 0.0)
    w_conv = jnp.transpose(params['w_up'][:, :, ::-1, ::-1],
                           (1, 0, 2, 3)).astype(jnp.bfloat16)
    y = lax.conv_general_dilated(hr, w_conv, (1, 1), [(2, 2), (2, 2)],
                                 lhs_dilation=(2, 2),
                                 dimension_numbers=('NCHW', 'OIHW', 'NCHW'),
                                 preferred_element_type=jnp.float32)
    mean = jnp.mean(y, axis=(0, 2, 3), keepdims=True)
    var = jnp.mean(jnp.square(y - mean), axis=(0, 2, 3), keepdims=True)
    yn = (y - mean) * lax.rsqrt(var + 1e-5) * params['gamma'].reshape(1, -1, 1, 1) \
        + params['beta'].reshape(1, -1, 1, 1)
    return jnp.concatenate([xf, yn], axis=1)


if __name__ == "__main__":
    key = jax.random.PRNGKey(0)
    kx, kp = jax.random.split(key)

    N, outer_nc, inner_nc, H, W = 2, 4, 8, 16, 16
    input_nc = outer_nc      # input_nc=None in the torch module -> input_nc = outer_nc

    x = jax.random.normal(kx, (N, input_nc, H, W), jnp.float32)
    params = init_params(kp, input_nc, inner_nc, outer_nc)
    prep = prepare_params(params)     # hoisted one-time weight packing

    fwd = jax.jit(unet_innermost_block)
    out = jax.block_until_ready(fwd(prep, x))
    assert out.shape == (N, input_nc + outer_nc, H, W), out.shape

    ref = reference(params, x)
    err = float(jnp.max(jnp.abs(out - ref)))
    assert bool(jnp.all(jnp.isfinite(out))), "non-finite output"
    assert jnp.allclose(out, ref, atol=2e-2, rtol=2e-2), f"max abs err {err}"

    print("KERNEL_OK")
</pallas_src>

<mosaic_0001>
module attributes {stable_mosaic.version = 11 : i64} {
  func.func @_matmul_act_kernel(%arg0: i32, %arg1: i32, %arg2: i32, %arg3: i32, %arg4: memref<1x128x64xbf16, #tpu.memory_space<vmem>>, %arg5: memref<1x64x128xbf16, #tpu.memory_space<vmem>>, %arg6: memref<1x128x128xbf16, #tpu.memory_space<vmem>>, %arg7: memref<128x128xf32, #tpu.memory_space<vmem>>) attributes {dimension_semantics = [#tpu.dimension_semantics<parallel>, #tpu.dimension_semantics<parallel>, #tpu.dimension_semantics<parallel>, #tpu.dimension_semantics<arbitrary>], iteration_bounds = array<i64: 1, 1, 1, 1>, scalar_prefetch = 0 : i64, scratch_operands = 1 : i64, tpu.core_type = #tpu.core_type<tc>, window_params = [{transform_indices = @transform_0, window_bounds = array<i64: 1, 128, 64>}, {transform_indices = @transform_1, window_bounds = array<i64: 1, 64, 128>}, {transform_indices = @transform_2, window_bounds = array<i64: 1, 128, 128>}]} {
    %c0_i32 = arith.constant 0 : i32
    %0 = arith.cmpi eq, %arg3, %c0_i32 : i32
    %1 = arith.extui %0 : i1 to i32
    %c0_i32_0 = arith.constant 0 : i32
    %2 = arith.cmpi ne, %1, %c0_i32_0 : i32
    scf.if %2 {
      %cst_14 = arith.constant 0.000000e+00 : f32
      %21 = vector.broadcast %cst_14 : f32 to vector<128x128xf32>
      %c0_15 = arith.constant 0 : index
      %c0_16 = arith.constant 0 : index
      %22 = vector.load %arg7[%c0_15, %c0_16] : memref<128x128xf32, #tpu.memory_space<vmem>>, vector<128x128xf32>
      tpu.vector_store %arg7[%c0_15, %c0_16], %21 {strides = array<i32>} : memref<128x128xf32, #tpu.memory_space<vmem>>, vector<128x128xf32>,
    } else {
    }
    %c0 = arith.constant 0 : index
    %c0_1 = arith.constant 0 : index
    %c0_2 = arith.constant 0 : index
    %3 = vector.load %arg4[%c0, %c0_1, %c0_2] : memref<1x128x64xbf16, #tpu.memory_space<vmem>>, vector<1x128x64xbf16>
    %4 = vector.shape_cast %3 : vector<1x128x64xbf16> to vector<128x64xbf16>
    %5 = arith.extf %4 : vector<128x64xbf16> to vector<128x64xf32>
    %cst = arith.constant 0.000000e+00 : f32
    %6 = vector.broadcast %cst : f32 to vector<128x64xf32>
    %7 = arith.cmpf oge, %5, %6 : vector<128x64xf32>
    %cst_3 = arith.constant 2.000000e-01 : f32
    %8 = vector.broadcast %cst_3 : f32 to vector<128x64xf32>
    %9 = arith.mulf %5, %8 : vector<128x64xf32>
    %10 = arith.select %7, %5, %9 : vector<128x64xi1>, vector<128x64xf32>
    %c0_4 = arith.constant 0 : index
    %c0_5 = arith.constant 0 : index
    %11 = vector.load %arg7[%c0_4, %c0_5] : memref<128x128xf32, #tpu.memory_space<vmem>>, vector<128x128xf32>
    %12 = arith.truncf %10 : vector<128x64xf32> to vector<128x64xbf16>
    %c0_6 = arith.constant 0 : index
    %c0_7 = arith.constant 0 : index
    %c0_8 = arith.constant 0 : index
    %13 = vector.load %arg5[%c0_6, %c0_7, %c0_8] : memref<1x64x128xbf16, #tpu.memory_space<vmem>>, vector<1x64x128xbf16>
    %14 = vector.shape_cast %13 : vector<1x64x128xbf16> to vector<64x128xbf16>
    %cst_9 = arith.constant dense<0.000000e+00> : vector<128x128xf32>
    %15 = tpu.matmul %12, %14, %cst_9 {dimension_numbers = #tpu.dot_dimension_numbers<[1], [0], [0], [1], [0, 0, 1, 1], [], []>} : vector<128x64xbf16>, vector<64x128xbf16>, vector<128x128xf32> -> vector<128x128xf32>
    %16 = arith.addf %11, %15 : vector<128x128xf32>
    %c0_10 = arith.constant 0 : index
    %c0_11 = arith.constant 0 : index
    %17 = vector.load %arg7[%c0_10, %c0_11] : memref<128x128xf32, #tpu.memory_space<vmem>>, vector<128x128xf32>
    tpu.vector_store %arg7[%c0_10, %c0_11], %16 {strides = array<i32>} : memref<128x128xf32, #tpu.memory_space<vmem>>, vector<128x128xf32>,
    %c0_i32_12 = arith.constant 0 : i32
    %18 = arith.cmpi eq, %arg3, %c0_i32_12 : i32
    %19 = arith.extui %18 : i1 to i32
    %c0_i32_13 = arith.constant 0 : i32
    %20 = arith.cmpi ne, %19, %c0_i32_13 : i32
    scf.if %20 {
      %c0_14 = arith.constant 0 : index
      %c0_15 = arith.constant 0 : index
      %21 = vector.load %arg7[%c0_14, %c0_15] : memref<128x128xf32, #tpu.memory_space<vmem>>, vector<128x128xf32>
      %22 = arith.truncf %21 : vector<128x128xf32> to vector<128x128xbf16>
      %c0_16 = arith.constant 0 : index
      %c0_17 = arith.constant 0 : index
      %c0_18 = arith.constant 0 : index
      %23 = vector.load %arg6[%c0_16, %c0_17, %c0_18] : memref<1x128x128xbf16, #tpu.memory_space<vmem>>, vector<1x128x128xbf16>
      %24 = vector.shape_cast %23 : vector<1x128x128xbf16> to vector<128x128xbf16>
      %25 = vector.shape_cast %22 : vector<128x128xbf16> to vector<1x128x128xbf16>
      tpu.vector_store %arg6[%c0_16, %c0_17, %c0_18], %25 {strides = array<i32>} : memref<1x128x128xbf16, #tpu.memory_space<vmem>>, vector<1x128x128xbf16>,
    } else {
    }
    return
  }
  func.func @transform_0(%arg0: i32, %arg1: i32, %arg2: i32, %arg3: i32) -> (i32, i32, i32) {
    %c0_i32 = arith.constant 0 : i32
    return %arg0, %arg1, %arg3 : i32, i32, i32
  }
  func.func @transform_1(%arg0: i32, %arg1: i32, %arg2: i32, %arg3: i32) -> (i32, i32, i32) {
    %c0_i32 = arith.constant 0 : i32
    return %arg0, %arg3, %arg2 : i32, i32, i32
  }
  func.func @transform_2(%arg0: i32, %arg1: i32, %arg2: i32, %arg3: i32) -> (i32, i32, i32) {
    %c0_i32 = arith.constant 0 : i32
    return %arg0, %arg1, %arg2 : i32, i32, i32
  }
}

module attributes {stable_mosaic.version = 11 : i64} {
  func.func @_matmul_act_kernel(%arg0: i32, %arg1: i32, %arg2: i32, %arg3: i32, %arg4: memref<1x128x32xbf16, #tpu.memory_space<vmem>>, %arg5: memref<1x32x128xbf16, #tpu.memory_space<vmem>>, %arg6: memref<1x128x128xf32, #tpu.memory_space<vmem>>, %arg7: memref<128x128xf32, #tpu.memory_space<vmem>>) attributes {dimension_semantics = [#tpu.dimension_semantics<parallel>, #tpu.dimension_semantics<parallel>, #tpu.dimension_semantics<parallel>, #tpu.dimension_semantics<arbitrary>], iteration_bounds = array<i64: 4, 1, 1, 1>, scalar_prefetch = 0 : i64, scratch_operands = 1 : i64, tpu.core_type = #tpu.core_type<tc>, window_params = [{transform_indices = @transform_0, window_bounds = array<i64: 1, 128, 32>}, {transform_indices = @transform_1, window_bounds = array<i64: 1, 32, 128>}, {transform_indices = @transform_2, window_bounds = array<i64: 1, 128, 128>}]} {
    %c0_i32 = arith.constant 0 : i32
    %0 = arith.cmpi eq, %arg3, %c0_i32 : i32
    %1 = arith.extui %0 : i1 to i32
    %c0_i32_0 = arith.constant 0 : i32
    %2 = arith.cmpi ne, %1, %c0_i32_0 : i32
    scf.if %2 {
      %cst_14 = arith.constant 0.000000e+00 : f32
      %21 = vector.broadcast %cst_14 : f32 to vector<128x128xf32>
      %c0_15 = arith.constant 0 : index
      %c0_16 = arith.constant 0 : index
      %22 = vector.load %arg7[%c0_15, %c0_16] : memref<128x128xf32, #tpu.memory_space<vmem>>, vector<128x128xf32>
      tpu.vector_store %arg7[%c0_15, %c0_16], %21 {strides = array<i32>} : memref<128x128xf32, #tpu.memory_space<vmem>>, vector<128x128xf32>,
    } else {
    }
    %c0 = arith.constant 0 : index
    %c0_1 = arith.constant 0 : index
    %c0_2 = arith.constant 0 : index
    %3 = vector.load %arg4[%c0, %c0_1, %c0_2] : memref<1x128x32xbf16, #tpu.memory_space<vmem>>, vector<1x128x32xbf16>
    %4 = vector.shape_cast %3 : vector<1x128x32xbf16> to vector<128x32xbf16>
    %5 = arith.extf %4 : vector<128x32xbf16> to vector<128x32xf32>
    %cst = arith.constant 0.000000e+00 : f32
    %6 = vector.broadcast %cst : f32 to vector<128x32xf32>
    %7 = arith.cmpf oge, %5, %6 : vector<128x32xf32>
    %cst_3 = arith.constant 0.000000e+00 : f32
    %8 = vector.broadcast %cst_3 : f32 to vector<128x32xf32>
    %9 = arith.mulf %5, %8 : vector<128x32xf32>
    %10 = arith.select %7, %5, %9 : vector<128x32xi1>, vector<128x32xf32>
    %c0_4 = arith.constant 0 : index
    %c0_5 = arith.constant 0 : index
    %11 = vector.load %arg7[%c0_4, %c0_5] : memref<128x128xf32, #tpu.memory_space<vmem>>, vector<128x128xf32>
    %12 = arith.truncf %10 : vector<128x32xf32> to vector<128x32xbf16>
    %c0_6 = arith.constant 0 : index
    %c0_7 = arith.constant 0 : index
    %c0_8 = arith.constant 0 : index
    %13 = vector.load %arg5[%c0_6, %c0_7, %c0_8] : memref<1x32x128xbf16, #tpu.memory_space<vmem>>, vector<1x32x128xbf16>
    %14 = vector.shape_cast %13 : vector<1x32x128xbf16> to vector<32x128xbf16>
    %cst_9 = arith.constant dense<0.000000e+00> : vector<128x128xf32>
    %15 = tpu.matmul %12, %14, %cst_9 {dimension_numbers = #tpu.dot_dimension_numbers<[1], [0], [0], [1], [0, 0, 1, 1], [], []>} : vector<128x32xbf16>, vector<32x128xbf16>, vector<128x128xf32> -> vector<128x128xf32>
    %16 = arith.addf %11, %15 : vector<128x128xf32>
    %c0_10 = arith.constant 0 : index
    %c0_11 = arith.constant 0 : index
    %17 = vector.load %arg7[%c0_10, %c0_11] : memref<128x128xf32, #tpu.memory_space<vmem>>, vector<128x128xf32>
    tpu.vector_store %arg7[%c0_10, %c0_11], %16 {strides = array<i32>} : memref<128x128xf32, #tpu.memory_space<vmem>>, vector<128x128xf32>,
    %c0_i32_12 = arith.constant 0 : i32
    %18 = arith.cmpi eq, %arg3, %c0_i32_12 : i32
    %19 = arith.extui %18 : i1 to i32
    %c0_i32_13 = arith.constant 0 : i32
    %20 = arith.cmpi ne, %19, %c0_i32_13 : i32
    scf.if %20 {
      %c0_14 = arith.constant 0 : index
      %c0_15 = arith.constant 0 : index
      %21 = vector.load %arg7[%c0_14, %c0_15] : memref<128x128xf32, #tpu.memory_space<vmem>>, vector<128x128xf32>
      %c0_16 = arith.constant 0 : index
      %c0_17 = arith.constant 0 : index
      %c0_18 = arith.constant 0 : index
      %22 = vector.load %arg6[%c0_16, %c0_17, %c0_18] : memref<1x128x128xf32, #tpu.memory_space<vmem>>, vector<1x128x128xf32>
      %23 = vector.shape_cast %22 : vector<1x128x128xf32> to vector<128x128xf32>
      %24 = vector.shape_cast %21 : vector<128x128xf32> to vector<1x128x128xf32>
      tpu.vector_store %arg6[%c0_16, %c0_17, %c0_18], %24 {strides = array<i32>} : memref<1x128x128xf32, #tpu.memory_space<vmem>>, vector<1x128x128xf32>,
    } else {
    }
    return
  }
  func.func @transform_0(%arg0: i32, %arg1: i32, %arg2: i32, %arg3: i32) -> (i32, i32, i32) {
    %c0_i32 = arith.constant 0 : i32
    return %arg0, %arg1, %arg3 : i32, i32, i32
  }
  func.func @transform_1(%arg0: i32, %arg1: i32, %arg2: i32, %arg3: i32) -> (i32, i32, i32) {
    %c0_i32 = arith.constant 0 : i32
    return %arg0, %arg3, %arg2 : i32, i32, i32
  }
  func.func @transform_2(%arg0: i32, %arg1: i32, %arg2: i32, %arg3: i32) -> (i32, i32, i32) {
    %c0_i32 = arith.constant 0 : i32
    return %arg0, %arg1, %arg2 : i32, i32, i32
  }
}

module attributes {stable_mosaic.version = 11 : i64} {
  func.func @_bn_stats_kernel(%arg0: i32, %arg1: memref<512x4xf32, #tpu.memory_space<vmem>>, %arg2: memref<1x4xf32, #tpu.memory_space<vmem>>, %arg3: memref<1x4xf32, #tpu.memory_space<vmem>>) attributes {dimension_semantics = [#tpu.dimension_semantics<arbitrary>], iteration_bounds = array<i64: 1>, scalar_prefetch = 0 : i64, scratch_operands = 0 : i64, tpu.core_type = #tpu.core_type<tc>, window_params = [{transform_indices = @transform_0, window_bounds = array<i64: 512, 4>}, {pipeline_mode = #tpu.pipeline_mode<synchronous>, transform_indices = @transform_1, window_bounds = array<i64: 1, 4>}, {pipeline_mode = #tpu.pipeline_mode<synchronous>, transform_indices = @transform_2, window_bounds = array<i64: 1, 4>}]} {
    %c0_i32 = arith.constant 0 : i32
    %0 = arith.cmpi eq, %arg0, %c0_i32 : i32
    %1 = arith.extui %0 : i1 to i32
    %c0_i32_0 = arith.constant 0 : i32
    %2 = arith.cmpi ne, %1, %c0_i32_0 : i32
    scf.if %2 {
      %cst_11 = arith.constant 0.000000e+00 : f32
      %15 = vector.broadcast %cst_11 : f32 to vector<1x4xf32>
      %c0_12 = arith.constant 0 : index
      %c0_13 = arith.constant 0 : index
      %16 = vector.load %arg2[%c0_12, %c0_13] : memref<1x4xf32, #tpu.memory_space<vmem>>, vector<1x4xf32>
      tpu.vector_store %arg2[%c0_12, %c0_13], %15 {strides = array<i32>} : memref<1x4xf32, #tpu.memory_space<vmem>>, vector<1x4xf32>,
      %cst_14 = arith.constant 0.000000e+00 : f32
      %17 = vector.broadcast %cst_14 : f32 to vector<1x4xf32>
      %c0_15 = arith.constant 0 : index
      %c0_16 = arith.constant 0 : index
      %18 = vector.load %arg3[%c0_15, %c0_16] : memref<1x4xf32, #tpu.memory_space<vmem>>, vector<1x4xf32>
      tpu.vector_store %arg3[%c0_15, %c0_16], %17 {strides = array<i32>} : memref<1x4xf32, #tpu.memory_space<vmem>>, vector<1x4xf32>,
    } else {
    }
    %c0 = arith.constant 0 : index
    %c0_1 = arith.constant 0 : index
    %3 = vector.load %arg1[%c0, %c0_1] : memref<512x4xf32, #tpu.memory_space<vmem>>, vector<512x4xf32>
    %c0_2 = arith.constant 0 : index
    %c0_3 = arith.constant 0 : index
    %4 = vector.load %arg2[%c0_2, %c0_3] : memref<1x4xf32, #tpu.memory_space<vmem>>, vector<1x4xf32>
    %cst = arith.constant dense<0.000000e+00> : vector<4xf32>
    %5 = vector.multi_reduction <add>, %3, %cst [0] : vector<512x4xf32> to vector<4xf32>
    %6 = vector.shape_cast %5 : vector<4xf32> to vector<1x4xf32>
    %7 = arith.addf %4, %6 : vector<1x4xf32>
    %c0_4 = arith.constant 0 : index
    %c0_5 = arith.constant 0 : index
    %8 = vector.load %arg2[%c0_4, %c0_5] : memref<1x4xf32, #tpu.memory_space<vmem>>, vector<1x4xf32>
    tpu.vector_store %arg2[%c0_4, %c0_5], %7 {strides = array<i32>} : memref<1x4xf32, #tpu.memory_space<vmem>>, vector<1x4xf32>,
    %c0_6 = arith.constant 0 : index
    %c0_7 = arith.constant 0 : index
    %9 = vector.load %arg3[%c0_6, %c0_7] : memref<1x4xf32, #tpu.memory_space<vmem>>, vector<1x4xf32>
    %10 = arith.mulf %3, %3 : vector<512x4xf32>
    %cst_8 = arith.constant dense<0.000000e+00> : vector<4xf32>
    %11 = vector.multi_reduction <add>, %10, %cst_8 [0] : vector<512x4xf32> to vector<4xf32>
    %12 = vector.shape_cast %11 : vector<4xf32> to vector<1x4xf32>
    %13 = arith.addf %9, %12 : vector<1x4xf32>
    %c0_9 = arith.constant 0 : index
    %c0_10 = arith.constant 0 : index
    %14 = vector.load %arg3[%c0_9, %c0_10] : memref<1x4xf32, #tpu.memory_space<vmem>>, vector<1x4xf32>
    tpu.vector_store %arg3[%c0_9, %c0_10], %13 {strides = array<i32>} : memref<1x4xf32, #tpu.memory_space<vmem>>, vector<1x4xf32>,
    return
  }
  func.func @transform_0(%arg0: i32) -> (i32, i32) {
    %c0_i32 = arith.constant 0 : i32
    %c0_i32_0 = arith.constant 0 : i32
    return %arg0, %c0_i32 : i32, i32
  }
  func.func @transform_1(%arg0: i32) -> (i32, i32) {
    %c0_i32 = arith.constant 0 : i32
    %c0_i32_0 = arith.constant 0 : i32
    %c0_i32_1 = arith.constant 0 : i32
    return %c0_i32, %c0_i32_0 : i32, i32
  }
  func.func @transform_2(%arg0: i32) -> (i32, i32) {
    %c0_i32 = arith.constant 0 : i32
    %c0_i32_0 = arith.constant 0 : i32
    %c0_i32_1 = arith.constant 0 : i32
    return %c0_i32, %c0_i32_0 : i32, i32
  }
}

module attributes {stable_mosaic.version = 11 : i64} {
  func.func @_bn_apply_kernel(%arg0: i32, %arg1: memref<512x4xf32, #tpu.memory_space<vmem>>, %arg2: memref<1x4xf32, #tpu.memory_space<vmem>>, %arg3: memref<1x4xf32, #tpu.memory_space<vmem>>, %arg4: memref<512x4xf32, #tpu.memory_space<vmem>>) attributes {dimension_semantics = [#tpu.dimension_semantics<parallel>], iteration_bounds = array<i64: 1>, scalar_prefetch = 0 : i64, scratch_operands = 0 : i64, tpu.core_type = #tpu.core_type<tc>, window_params = [{transform_indices = @transform_0, window_bounds = array<i64: 512, 4>}, {pipeline_mode = #tpu.pipeline_mode<synchronous>, transform_indices = @transform_1, window_bounds = array<i64: 1, 4>}, {pipeline_mode = #tpu.pipeline_mode<synchronous>, transform_indices = @transform_2, window_bounds = array<i64: 1, 4>}, {transform_indices = @transform_3, window_bounds = array<i64: 512, 4>}]} {
    %c0 = arith.constant 0 : index
    %c0_0 = arith.constant 0 : index
    %0 = vector.load %arg1[%c0, %c0_0] : memref<512x4xf32, #tpu.memory_space<vmem>>, vector<512x4xf32>
    %c0_1 = arith.constant 0 : index
    %c0_2 = arith.constant 0 : index
    %1 = vector.load %arg2[%c0_1, %c0_2] : memref<1x4xf32, #tpu.memory_space<vmem>>, vector<1x4xf32>
    %2 = vector.broadcast %1 : vector<1x4xf32> to vector<512x4xf32>
    %3 = arith.mulf %0, %2 : vector<512x4xf32>
    %c0_3 = arith.constant 0 : index
    %c0_4 = arith.constant 0 : index
    %4 = vector.load %arg3[%c0_3, %c0_4] : memref<1x4xf32, #tpu.memory_space<vmem>>, vector<1x4xf32>
    %5 = vector.broadcast %4 : vector<1x4xf32> to vector<512x4xf32>
    %6 = arith.addf %3, %5 : vector<512x4xf32>
    %c0_5 = arith.constant 0 : index
    %c0_6 = arith.constant 0 : index
    %7 = vector.load %arg4[%c0_5, %c0_6] : memref<512x4xf32, #tpu.memory_space<vmem>>, vector<512x4xf32>
    tpu.vector_store %arg4[%c0_5, %c0_6], %6 {strides = array<i32>} : memref<512x4xf32, #tpu.memory_space<vmem>>, vector<512x4xf32>,
    return
  }
  func.func @transform_0(%arg0: i32) -> (i32, i32) {
    %c0_i32 = arith.constant 0 : i32
    %c0_i32_0 = arith.constant 0 : i32
    return %arg0, %c0_i32 : i32, i32
  }
  func.func @transform_1(%arg0: i32) -> (i32, i32) {
    %c0_i32 = arith.constant 0 : i32
    %c0_i32_0 = arith.constant 0 : i32
    %c0_i32_1 = arith.constant 0 : i32
    return %c0_i32, %c0_i32_0 : i32, i32
  }
  func.func @transform_2(%arg0: i32) -> (i32, i32) {
    %c0_i32 = arith.constant 0 : i32
    %c0_i32_0 = arith.constant 0 : i32
    %c0_i32_1 = arith.constant 0 : i32
    return %c0_i32, %c0_i32_0 : i32, i32
  }
  func.func @transform_3(%arg0: i32) -> (i32, i32) {
    %c0_i32 = arith.constant 0 : i32
    %c0_i32_0 = arith.constant 0 : i32
    return %arg0, %c0_i32 : i32, i32
  }
}

</mosaic_0001>

<bundles_post_ra>
// kernel: unet_innermost_block.4
= control target key start
LH: loop header
LB: loop body
LE: loop exit
PB: predicated region body
PF: predicated region fallthrough
CT: control target
= control target key end

     0   :  { %vm168_vm0 = vcmask 523264   ;;  %s688_s1 = inlined_call_operand.vmem [shape: bf16[1,64,128], index: 1, kind: input, shape index: {}]   ;;  %s689_s0 = inlined_call_operand.vmem [shape: bf16[1,128,64], index: 0, kind: input, shape index: {}]   ;;  %s690_s2 = inlined_call_operand.vmem [shape: bf16[1,128,128], index: 2, kind: output, shape index: {}]  }
   0x1   :  { %v599_v0 = vld [vmem:[%s688_s1] sm:$0xff]   ;;  %v600_v1 = vld [vmem:[%s688_s1 + $0x8] sm:$0xff]   ;;  %v601_v2 = vld [vmem:[%s688_s1 + $0x10] sm:$0xff]  }
   0x2   :  { %567 = vmatprep.subr.bf16.mxu0 %v599_v0  ;;  %591 = vmatprep.subr.bf16.mxu1 %v599_v0  ;;  %v470_v3 = vld [vmem:[%s689_s0] sm:$0xff]   ;;  %v541_v5 = vld [vmem:[%s689_s0 + $0x8] sm:$0xff]   ;;  %v602_v11 = vld [vmem:[%s688_s1 + $0x18] sm:$0xff]  }
   0x3   :  { %568 = vmatpush3.bf16.msra.mxu0 %v599_v0  ;;  %595 = vmatpush3.bf16.msra.mxu1 %v599_v0  ;;  %v544_v4 = vld [vmem:[%s689_s0 + $0x20] sm:$0xff]   ;;  %v471_v6 = vunpack.c.l.bf16 %v470_v3  ;;  %v472_v7 = vunpack.c.h.bf16 %v470_v3  ;;  %v545_v10 = vld [vmem:[%s689_s0 + $0x28] sm:$0xff]   ;;  %v475_v12 = vunpack.c.l.bf16 %v541_v5  ;;  %v476_v13 = vunpack.c.h.bf16 %v541_v5  ;;  %v542_v22 = vld [vmem:[%s689_s0 + $0x10] sm:$0xff]  }
   0x4   :  { %569 = vmatprep.subr.bf16.mxu0 %v600_v1  ;;  %592 = vmatprep.subr.bf16.mxu1 %v600_v1  ;;  %v487_v8 = vunpack.c.l.bf16 %v544_v4  ;;  %v488_v9 = vunpack.c.h.bf16 %v544_v4  ;;  %v491_v14 = vunpack.c.l.bf16 %v545_v10  ;;  %v492_v15 = vunpack.c.h.bf16 %v545_v10  ;;  %v546_v27 = vld [vmem:[%s689_s0 + $0x30] sm:$0xff]   ;;  %v543_v41 = vld [vmem:[%s689_s0 + $0x18] sm:$0xff]  }
   0x5   :  { %vm64_vm1 = vcmp.ge.f32.partialorder %v471_v6, 0.0  ;;  %vm65_vm2 = vcmp.ge.f32.partialorder %v472_v7, 0.0  ;;  %v80_v16 = vmul.f32 0.2, %v471_v6  ;;  %v81_v17 = vmul.f32 0.2, %v472_v7 }
   0x6   :  { %vm72_vm3 = vcmp.ge.f32.partialorder %v487_v8, 0.0  ;;  %vm73_vm4 = vcmp.ge.f32.partialorder %v488_v9, 0.0  ;;  %v88_v18 = vmul.f32 0.2, %v487_v8  ;;  %v89_v19 = vmul.f32 0.2, %v488_v9 }
   0x7   :  { %570 = vmatpush3.bf16.msra.mxu0 %v600_v1  ;;  %596 = vmatpush3.bf16.msra.mxu1 %v600_v1  ;;  %v96_v20 = vsel %vm64_vm1, %v471_v6, %v80_v16  ;;  %v97_v21 = vsel %vm65_vm2, %v472_v7, %v81_v17  ;;  %vm66_vm5 = vcmp.ge.f32.partialorder %v475_v12, 0.0  ;;  %vm67_vm6 = vcmp.ge.f32.partialorder %v476_v13, 0.0  ;;  %v547_v45 = vld [vmem:[%s689_s0 + $0x38] sm:$0xff]  }
   0x8   :  { %571 = vmatprep.subr.bf16.mxu0 %v601_v2  ;;  %593 = vmatprep.subr.bf16.mxu1 %v601_v2  ;;  %v128_v23 = vpack.c.bf16 %v97_v21, %v96_v20  ;;  %v104_v24 = vsel %vm72_vm3, %v487_v8, %v88_v18  ;;  %v105_v25 = vsel %vm73_vm4, %v488_v9, %v89_v19  ;;  %v82_v26 = vmul.f32 0.2, %v475_v12 }
   0x9   :  { %v132_v28 = vpack.c.bf16 %v105_v25, %v104_v24  ;;  %v83_v29 = vmul.f32 0.2, %v476_v13  ;;  %vm74_vm7 = vcmp.ge.f32.partialorder %v491_v14, 0.0  ;;  %vm75_vm8 = vcmp.ge.f32.partialorder %v492_v15, 0.0 }
   0xa   :  { %v98_v30 = vsel %vm66_vm5, %v475_v12, %v82_v26  ;;  %v90_v31 = vmul.f32 0.2, %v491_v14  ;;  %v91_v32 = vmul.f32 0.2, %v492_v15  ;;  %v479_v33 = vunpack.c.l.bf16 %v542_v22  ;;  %575 = vmatprep.mubr.msk.bf16.mxu0 %vm168_vm0, %v128_v23 }
   0xb   :  { %572 = vmatpush3.bf16.msra.mxu0 %v601_v2  ;;  %597 = vmatpush3.bf16.msra.mxu1 %v601_v2  ;;  %v99_v34 = vsel %vm67_vm6, %v476_v13, %v83_v29  ;;  %v480_v35 = vunpack.c.h.bf16 %v542_v22  ;;  %v495_v36 = vunpack.c.l.bf16 %v546_v27  ;;  %v496_v37 = vunpack.c.h.bf16 %v546_v27 }
   0xc   :  { %573 = vmatprep.subr.bf16.mxu0 %v602_v11  ;;  %594 = vmatprep.subr.bf16.mxu1 %v602_v11  ;;  %v129_v38 = vpack.c.bf16 %v99_v34, %v98_v30  ;;  %v106_v39 = vsel %vm74_vm7, %v491_v14, %v90_v31  ;;  %v107_v40 = vsel %vm75_vm8, %v492_v15, %v91_v32  ;;  %vm68_vm9 = vcmp.ge.f32.partialorder %v479_v33, 0.0 }
   0xd   :  { %583 = vmatprep.mubr.msk.bf16.mxu1 %vm168_vm0, %v132_v28  ;;  %v133_v42 = vpack.c.bf16 %v107_v40, %v106_v39  ;;  %vm69_vm10 = vcmp.ge.f32.partialorder %v480_v35, 0.0  ;;  %v84_v43 = vmul.f32 0.2, %v479_v33  ;;  %v85_v44 = vmul.f32 0.2, %v480_v35 }
   0xe   :  { %vm76_vm11 = vcmp.ge.f32.partialorder %v495_v36, 0.0  ;;  %vm77_vm12 = vcmp.ge.f32.partialorder %v496_v37, 0.0  ;;  %v92_v46 = vmul.f32 0.2, %v495_v36  ;;  %v93_v47 = vmul.f32 0.2, %v496_v37 }
   0xf   :  { %574 = vmatpush3.bf16.msra.mxu0 %v602_v11  ;;  %598 = vmatpush3.bf16.msra.mxu1 %v602_v11  ;;  %v100_v48 = vsel %vm68_vm9, %v479_v33, %v84_v43  ;;  %v101_v49 = vsel %vm69_vm10, %v480_v35, %v85_v44  ;;  %v483_v50 = vunpack.c.l.bf16 %v543_v41  ;;  %v484_v51 = vunpack.c.h.bf16 %v543_v41 }
  0x10   :  { %v130_v52 = vpack.c.bf16 %v101_v49, %v100_v48  ;;  %v108_v53 = vsel %vm76_vm11, %v495_v36, %v92_v46  ;;  %v109_v54 = vsel %vm77_vm12, %v496_v37, %v93_v47  ;;  %v499_v55 = vunpack.c.l.bf16 %v547_v45 }
  0x11   :  { %v134_v56 = vpack.c.bf16 %v109_v54, %v108_v53  ;;  %vm70_vm13 = vcmp.ge.f32.partialorder %v483_v50, 0.0  ;;  %vm71_vm14 = vcmp.ge.f32.partialorder %v484_v51, 0.0  ;;  %v86_v57 = vmul.f32 0.2, %v483_v50 }
  0x12   :  { %576 = vmatmul.mubr.msk.bf16.vlgmr.msra.gmra.mrb[0].mxu0 %vm168_vm0, %v129_v38  ;;  %584 = vmatmul.mubr.msk.bf16.vlgmr.msra.gmra.mrb[0].mxu1 %vm168_vm0, %v133_v42  ;;  %v87_v58 = vmul.f32 0.2, %v484_v51  ;;  %v500_v59 = vunpack.c.h.bf16 %v547_v45  ;;  %vm78_vm15 = vcmp.ge.f32.partialorder %v499_v55, 0.0  ;;  %v94_v60 = vmul.f32 0.2, %v499_v55 }
  0x13   :  { %579 = vmatprep.mubr.msk.bf16.mxu0 %vm168_vm0, %v130_v52  ;;  %587 = vmatprep.mubr.msk.bf16.mxu1 %vm168_vm0, %v134_v56  ;;  %v102_v61 = vsel %vm70_vm13, %v483_v50, %v86_v57 }
  0x14   :  { %v103_v62 = vsel %vm71_vm14, %v484_v51, %v87_v58  ;;  %vm79_vm1 = vcmp.ge.f32.partialorder %v500_v59, 0.0  ;;  %v95_v63 = vmul.f32 0.2, %v500_v59  ;;  %v110_v0 = vsel %vm78_vm15, %v499_v55, %v94_v60 }
  0x15   :  { %v131_v1 = vpack.c.bf16 %v103_v62, %v102_v61 }
  0x16   :  { %v111_v2 = vsel %vm79_vm1, %v500_v59, %v95_v63 }
  0x17   :  { %v135_v3 = vpack.c.bf16 %v111_v2, %v110_v0 }
  0x1a   :  { %580 = vmatmul.mubr.msk.bf16.gmra.mrb[4].mxu0 %vm168_vm0, %v131_v1  ;;  %588 = vmatmul.mubr.msk.bf16.gmra.mrb[4].mxu1 %vm168_vm0, %v135_v3 }
  0xe5   :  { %v577_v4 = vpop.f32.mrb[0].mxu0  ;;  %v585_v5 = vpop.f32.mrb[0].mxu1 }
  0xe6   :  { %v227_v6 = vpop.f32.mrb[1].mxu0  ;;  %v259_v7 = vpop.f32.mrb[1].mxu1 }
  0xe7   :  { %v578_v8 = vpop.f32.mrb[2].mxu0  ;;  %v586_v9 = vpop.f32.mrb[2].mxu1 }
  0xe8   :  { %v509_v10 = vpack.c.bf16 %v578_v8, %v577_v4  ;;  %v529_v11 = vpack.c.bf16 %v586_v9, %v585_v5  ;;  %v230_v12 = vpop.f32.mrb[3].mxu0  ;;  %v262_v13 = vpop.f32.mrb[3].mxu1 }
  0xe9   :  { %v504_v14 = vpack.c.bf16 %v230_v12, %v227_v6  ;;  %v524_v15 = vpack.c.bf16 %v262_v13, %v259_v7 }
  0xea   :  { %548 = vst [vmem:[%s690_s2 + $0x8] sm:$0xff] %v509_v10   ;;  %552 = vst [vmem:[%s690_s2 + $0x28] sm:$0xff] %v529_v11  }
  0xeb   :  { %505 = vst [vmem:[%s690_s2] sm:$0xff] %v504_v14   ;;  %551 = vst [vmem:[%s690_s2 + $0x20] sm:$0xff] %v524_v15  }
  0xed   :  { %v581_v16 = vpop.f32.mrb[4].mxu0  ;;  %v589_v17 = vpop.f32.mrb[4].mxu1 }
  0xee   :  { %v243_v18 = vpop.f32.mrb[5].mxu0  ;;  %v275_v19 = vpop.f32.mrb[5].mxu1 }
  0xef   :  { %v582_v20 = vpop.f32.mrb[6].mxu0  ;;  %v590_v22 = vpop.f32.mrb[6].mxu1 }
  0xf0   :  { %v519_v21 = vpack.c.bf16 %v582_v20, %v581_v16  ;;  %v246_v23 = vpop.f32.mrb[7].mxu0  ;;  %v539_v24 = vpack.c.bf16 %v590_v22, %v589_v17  ;;  %v278_v26 = vpop.f32.mrb[7].mxu1 }
  0xf1   :  { %v514_v25 = vpack.c.bf16 %v246_v23, %v243_v18  ;;  %v534_v27 = vpack.c.bf16 %v278_v26, %v275_v19 }
  0xf2   :  { %550 = vst [vmem:[%s690_s2 + $0x18] sm:$0xff] %v519_v21   ;;  %554 = vst [vmem:[%s690_s2 + $0x38] sm:$0xff] %v539_v24  }
  0xf3   :  { %549 = vst [vmem:[%s690_s2 + $0x10] sm:$0xff] %v514_v25   ;;  %553 = vst [vmem:[%s690_s2 + $0x30] sm:$0xff] %v534_v27  }

// kernel: unet_innermost_block.5
= control target key start
LH: loop header
LB: loop body
LE: loop exit
PB: predicated region body
PF: predicated region fallthrough
CT: control target
= control target key end

     0   :  { %s884_s9 = smov 0   ;;  %s886_s10 = smov 0   ;;  %s962_s0 = inlined_call_operand.vmem [shape: bf16[4,128,32], index: 0, kind: input, shape index: {}]   ;;  %s963_s1 = inlined_call_operand.vmem [shape: bf16[4,32,128], index: 1, kind: input, shape index: {}]   ;;  %s964_s2 = inlined_call_operand.vmem [shape: f32[4,128,128], index: 2, kind: output, shape index: {}]  }
   0x1   :  { %s888_s11 = smov 0  }
   0x2 LB: > { %s38_s12 = sadd.s32 1, %s863_s10  ;;  %p724_p0 = scmp.ge.s32.totalorder %s867_s11, 1  ;;  %s867_s11 = sphi %s888_s11, %s12_s11   ;;  %s863_s10 = sphi %s886_s10, %s966_s10   ;;  %s859_s9 = sphi %s884_s9, %s965_s9  }
   0x3   : > { %p40_p1 = scmp.ge.s32.totalorder %s38_s12, 4  ;;  %p176_p2 = scmp.lt.s32.totalorder %s867_s11, 5 }
   0x5   : > { %s968_s12 = smov (%p40_p1, %s38_s12), 0  ;;  %p177_p3 = pnand %p724_p0, %p176_p2 }
   0x6   : > { %p225_p4 = scmp.lt.s32.totalorder (!%p177_p3), %s859_s9, 3  ;;  %vm404_vm0 = vcmask (!%p177_p3), 261120  }
   0x7   : > { %180 = sbr.rel (%p177_p3) target bundleno = 255 (0xff), region = 28 }
   0xe   : > { %s970_s9 = smov (!%p225_p4, %s859_s9), 3 }
   0xf   : > { %s743_s13 = sshll.u32 %s970_s9, 6  ;;  %s744_s14 = sshll.u32 %s970_s9, 4 }
  0x10   : > { %s909_s17 = scalar_lea.vmem %s962_s0, %s743_s13  ;;  %s248_s20 = scalar_lea.vmem %s963_s1, %s744_s14 }
  0x11   : > { %v843_v0 = vld [vmem:[%s248_s20] sm:$0xff]   ;;  %v844_v1 = vld [vmem:[%s248_s20 + $0x8] sm:$0xff]   ;;  %v779_v20 = vld [vmem:[%s909_s17 + $0x10] sm:$0xff]   ;;  %s745_s21 = sshll.u32 %s970_s9, 7 }
  0x12   : > { %795 = vmatprep.subr.bf16.mxu0 %v843_v0  ;;  %815 = vmatprep.subr.bf16.mxu1 %v843_v0  ;;  %v747_v2 = vld [vmem:[%s909_s17] sm:$0xff]   ;;  %v778_v4 = vld [vmem:[%s909_s17 + $0x8] sm:$0xff]   ;;  %v783_v25 = vld [vmem:[%s909_s17 + $0x30] sm:$0xff]   ;;  %v756_v31 = vunpack.c.l.bf16 %v779_v20  ;;  %v757_v33 = vunpack.c.h.bf16 %v779_v20  ;;  %s935_s24 = scalar_lea.vmem %s964_s2, %s745_s21 }
  0x13   : > { %v781_v3 = vld [vmem:[%s909_s17 + $0x20] sm:$0xff]   ;;  %796 = vmatpush3.bf16.msra.mxu0 %v843_v0  ;;  %817 = vmatpush3.bf16.msra.mxu1 %v843_v0  ;;  %v748_v5 = vunpack.c.l.bf16 %v747_v2  ;;  %v749_v6 = vunpack.c.h.bf16 %v747_v2  ;;  %v782_v9 = vld [vmem:[%s909_s17 + $0x28] sm:$0xff]   ;;  %v752_v10 = vunpack.c.l.bf16 %v778_v4  ;;  %v753_v11 = vunpack.c.h.bf16 %v778_v4  ;;  %v780_v39 = vld [vmem:[%s909_s17 + $0x18] sm:$0xff]  }
  0x14   : > { %v764_v7 = vunpack.c.l.bf16 %v781_v3  ;;  %v765_v8 = vunpack.c.h.bf16 %v781_v3  ;;  %797 = vmatprep.subr.bf16.mxu0 %v844_v1  ;;  %816 = vmatprep.subr.bf16.mxu1 %v844_v1  ;;  %v768_v12 = vunpack.c.l.bf16 %v782_v9  ;;  %v769_v13 = vunpack.c.h.bf16 %v782_v9  ;;  %v784_v43 = vld [vmem:[%s909_s17 + $0x38] sm:$0xff]  }
  0x15   : > { %vm316_vm1 = vcmp.ge.f32.partialorder %v748_v5, 0.0  ;;  %vm317_vm2 = vcmp.ge.f32.partialorder %v749_v6, 0.0  ;;  %v332_v14 = vmul.f32 0.0, %v748_v5  ;;  %v333_v15 = vmul.f32 0.0, %v749_v6 }
  0x16   : > { %vm324_vm3 = vcmp.ge.f32.partialorder %v764_v7, 0.0  ;;  %vm325_vm4 = vcmp.ge.f32.partialorder %v765_v8, 0.0  ;;  %v340_v16 = vmul.f32 0.0, %v764_v7  ;;  %v341_v17 = vmul.f32 0.0, %v765_v8 }
  0x17   : > { %798 = vmatpush3.bf16.msra.mxu0 %v844_v1  ;;  %818 = vmatpush3.bf16.msra.mxu1 %v844_v1  ;;  %v348_v18 = vsel %vm316_vm1, %v748_v5, %v332_v14  ;;  %v349_v19 = vsel %vm317_vm2, %v749_v6, %v333_v15  ;;  %vm318_vm5 = vcmp.ge.f32.partialorder %v752_v10, 0.0  ;;  %vm319_vm6 = vcmp.ge.f32.partialorder %v753_v11, 0.0 }
  0x18   : > { %v380_v21 = vpack.c.bf16 %v349_v19, %v348_v18  ;;  %v356_v22 = vsel %vm324_vm3, %v764_v7, %v340_v16  ;;  %v357_v23 = vsel %vm325_vm4, %v765_v8, %v341_v17  ;;  %v334_v24 = vmul.f32 0.0, %v752_v10 }
  0x19   : > { %v384_v26 = vpack.c.bf16 %v357_v23, %v356_v22  ;;  %v335_v27 = vmul.f32 0.0, %v753_v11  ;;  %vm326_vm7 = vcmp.ge.f32.partialorder %v768_v12, 0.0  ;;  %vm327_vm8 = vcmp.ge.f32.partialorder %v769_v13, 0.0 }
  0x1a   : > { %799 = vmatprep.mubr.msk.bf16.mxu0 %vm404_vm0, %v380_v21  ;;  %v350_v28 = vsel %vm318_vm5, %v752_v10, %v334_v24  ;;  %v342_v29 = vmul.f32 0.0, %v768_v12  ;;  %v343_v30 = vmul.f32 0.0, %v769_v13  ;;  %v772_v34 = vunpack.c.l.bf16 %v783_v25 }
  0x1b   : > { %807 = vmatprep.mubr.msk.bf16.mxu1 %vm404_vm0, %v384_v26  ;;  %v351_v32 = vsel %vm319_vm6, %v753_v11, %v335_v27  ;;  %v773_v35 = vunpack.c.h.bf16 %v783_v25  ;;  %vm320_vm9 = vcmp.ge.f32.partialorder %v756_v31, 0.0  ;;  %vm321_vm10 = vcmp.ge.f32.partialorder %v757_v33, 0.0 }
  0x1c   : > { %v381_v36 = vpack.c.bf16 %v351_v32, %v350_v28  ;;  %v358_v37 = vsel %vm326_vm7, %v768_v12, %v342_v29  ;;  %v359_v38 = vsel %vm327_vm8, %v769_v13, %v343_v30  ;;  %v336_v41 = vmul.f32 0.0, %v756_v31 }
  0x1d   : > { %v385_v40 = vpack.c.bf16 %v359_v38, %v358_v37  ;;  %v337_v42 = vmul.f32 0.0, %v757_v33  ;;  %vm328_vm11 = vcmp.ge.f32.partialorder %v772_v34, 0.0  ;;  %vm329_vm12 = vcmp.ge.f32.partialorder %v773_v35, 0.0 }
  0x1e   : > { %800 = vmatmul.mubr.msk.bf16.vlgmr.msra.gmra.mrb[0].mxu0 %vm404_vm0, %v381_v36  ;;  %v344_v44 = vmul.f32 0.0, %v772_v34  ;;  %v345_v45 = vmul.f32 0.0, %v773_v35  ;;  %v352_v46 = vsel %vm320_vm9, %v756_v31, %v336_v41  ;;  %v760_v48 = vunpack.c.l.bf16 %v780_v39 }
  0x1f   : > { %808 = vmatmul.mubr.msk.bf16.vlgmr.msra.gmra.mrb[0].mxu1 %vm404_vm0, %v385_v40  ;;  %v353_v47 = vsel %vm321_vm10, %v757_v33, %v337_v42  ;;  %v761_v49 = vunpack.c.h.bf16 %v780_v39  ;;  %v776_v53 = vunpack.c.l.bf16 %v784_v43  ;;  %v777_v57 = vunpack.c.h.bf16 %v784_v43 }
  0x20   : > { %v382_v50 = vpack.c.bf16 %v353_v47, %v352_v46  ;;  %v360_v51 = vsel %vm328_vm11, %v772_v34, %v344_v44  ;;  %v361_v52 = vsel %vm329_vm12, %v773_v35, %v345_v45  ;;  %vm322_vm13 = vcmp.ge.f32.partialorder %v760_v48, 0.0 }
  0x21   : > { %v386_v54 = vpack.c.bf16 %v361_v52, %v360_v51  ;;  %vm323_vm14 = vcmp.ge.f32.partialorder %v761_v49, 0.0  ;;  %v338_v55 = vmul.f32 0.0, %v760_v48  ;;  %v339_v56 = vmul.f32 0.0, %v761_v49 }
  0x22   : > { %803 = vmatprep.mubr.msk.bf16.mxu0 %vm404_vm0, %v382_v50  ;;  %vm330_vm15 = vcmp.ge.f32.partialorder %v776_v53, 0.0  ;;  %v346_v58 = vmul.f32 0.0, %v776_v53  ;;  %vm331_vm1 = vcmp.ge.f32.partialorder %v777_v57, 0.0  ;;  %v347_v61 = vmul.f32 0.0, %v777_v57 }
  0x23   : > { %811 = vmatprep.mubr.msk.bf16.mxu1 %vm404_vm0, %v386_v54  ;;  %v354_v59 = vsel %vm322_vm13, %v760_v48, %v338_v55  ;;  %v355_v60 = vsel %vm323_vm14, %v761_v49, %v339_v56 }
  0x24   : > { %v362_v62 = vsel %vm330_vm15, %v776_v53, %v346_v58  ;;  %v383_v63 = vpack.c.bf16 %v355_v60, %v354_v59  ;;  %v363_v0 = vsel %vm331_vm1, %v777_v57, %v347_v61 }
  0x25   : > { %v387_v1 = vpack.c.bf16 %v363_v0, %v362_v62 }
  0x26   : > { %804 = vmatmul.mubr.msk.bf16.gmra.mrb[4].mxu0 %vm404_vm0, %v383_v63 }
  0x27   : > { %812 = vmatmul.mubr.msk.bf16.gmra.mrb[4].mxu1 %vm404_vm0, %v387_v1 }
  0xf1   : > { %v801_v2 = vpop.f32.mrb[0].mxu0 }
  0xf2   : > { %579 = vst [vmem:[%s935_s24 + $0x10] sm:$0xff] %v801_v2  ;;  %v809_v3 = vpop.f32.mrb[0].mxu1  ;;  %v463_v4 = vpop.f32.mrb[1].mxu0 }
  0xf3   : > { %587 = vst [vmem:[%s935_s24 + $0x50] sm:$0xff] %v809_v3  ;;  %577 = vst [vmem:[%s935_s24] sm:$0xff] %v463_v4  ;;  %v495_v5 = vpop.f32.mrb[1].mxu1  ;;  %v802_v6 = vpop.f32.mrb[2].mxu0 }
  0xf4   : > { %585 = vst [vmem:[%s935_s24 + $0x40] sm:$0xff] %v495_v5  ;;  %580 = vst [vmem:[%s935_s24 + $0x18] sm:$0xff] %v802_v6  ;;  %v810_v7 = vpop.f32.mrb[2].mxu1  ;;  %v466_v8 = vpop.f32.mrb[3].mxu0 }
  0xf5   : > { %588 = vst [vmem:[%s935_s24 + $0x58] sm:$0xff] %v810_v7  ;;  %578 = vst [vmem:[%s935_s24 + $0x8] sm:$0xff] %v466_v8  ;;  %v498_v9 = vpop.f32.mrb[3].mxu1 }
  0xf6   : > { %586 = vst [vmem:[%s935_s24 + $0x48] sm:$0xff] %v498_v9 }
  0xf9   : > { %v805_v10 = vpop.f32.mrb[4].mxu0 }
  0xfa   : > { %583 = vst [vmem:[%s935_s24 + $0x30] sm:$0xff] %v805_v10  ;;  %v479_v11 = vpop.f32.mrb[5].mxu0  ;;  %v813_v12 = vpop.f32.mrb[4].mxu1 }
  0xfb   : > { %581 = vst [vmem:[%s935_s24 + $0x20] sm:$0xff] %v479_v11  ;;  %v806_v13 = vpop.f32.mrb[6].mxu0  ;;  %591 = vst [vmem:[%s935_s24 + $0x70] sm:$0xff] %v813_v12  ;;  %v511_v14 = vpop.f32.mrb[5].mxu1 }
  0xfc   : > { %584 = vst [vmem:[%s935_s24 + $0x38] sm:$0xff] %v806_v13  ;;  %v482_v15 = vpop.f32.mrb[7].mxu0  ;;  %589 = vst [vmem:[%s935_s24 + $0x60] sm:$0xff] %v511_v14  ;;  %v814_v16 = vpop.f32.mrb[6].mxu1 }
  0xfd   : > { %582 = vst [vmem:[%s935_s24 + $0x28] sm:$0xff] %v482_v15  ;;  %592 = vst [vmem:[%s935_s24 + $0x78] sm:$0xff] %v814_v16  ;;  %v514_v17 = vpop.f32.mrb[7].mxu1 }
  0xfe   : > { %590 = vst [vmem:[%s935_s24 + $0x68] sm:$0xff] %v514_v17 }
  0xff PF: > { %s12_s11 = sadd.s32 1, %s867_s11   ;;  %s965_s9 = smov %s863_s10 }
 0x100   : > { %p9_p5 = scmp.ge.s32.totalorder %s12_s11, 6   ;;  %s966_s10 = smov %s968_s12 }
 0x102   :  { %11 = sbr.rel (!%p9_p5) target bundleno = 2 (0x2), region = 69 }

// kernel: unet_innermost_block.7
= control target key start
LH: loop header
LB: loop body
LE: loop exit
PB: predicated region body
PF: predicated region fallthrough
CT: control target
= control target key end

     0   :  { %vm220_vm0 = vcmask 31744   ;;  %s897_s0 = inlined_call_operand.vmem [shape: f32[512,4], index: 0, kind: input, shape index: {}]   ;;  %s898_s1 = inlined_call_operand.vmem [shape: f32[1,4], index: 1, kind: input, shape index: {}]   ;;  %s899_s2 = inlined_call_operand.vmem [shape: f32[1,4], index: 2, kind: input, shape index: {}]   ;;  %s900_s3 = inlined_call_operand.vmem [shape: f32[512,4], index: 3, kind: output, shape index: {}]  }
   0x1   :  { %v14_v0 = vld [vmem:[%s897_s0] sm:$0xff]  ;;  %v15_v4 = vld [vmem:[%s897_s0 + $0x8] sm:$0xff]  ;;  %v16_v5 = vld [vmem:[%s897_s0 + $0x10] sm:$0xff] }
   0x2   :  { %v317_v1 = vld [vmem:[%s898_s1] ss:$0 sm:$0xff]  ;;  %v17_v6 = vld [vmem:[%s897_s0 + $0x18] sm:$0xff]  ;;  %v19_v11 = vld [vmem:[%s897_s0 + $0x28] sm:$0xff] }
   0x3   :  { %v322_v2 = vld [vmem:[%s899_s2] ss:$0 sm:$0xff]  ;;  %v85_v3 = vmul.f32 %v317_v1, %v14_v0  ;;  %v86_v7 = vmul.f32 %v317_v1, %v15_v4  ;;  %v87_v8 = vmul.f32 %v317_v1, %v16_v5  ;;  %v88_v9 = vmul.f32 %v317_v1, %v17_v6  ;;  %v20_v12 = vld [vmem:[%s897_s0 + $0x30] sm:$0xff]  ;;  %v21_v17 = vld [vmem:[%s897_s0 + $0x38] sm:$0xff] }
   0x4   :  { %v18_v10 = vld [vmem:[%s897_s0 + $0x20] sm:$0xff]  ;;  %v90_v15 = vmul.f32 %v317_v1, %v19_v11  ;;  %v91_v16 = vmul.f32 %v317_v1, %v20_v12  ;;  %v23_v19 = vld [vmem:[%s897_s0 + $0x48] sm:$0xff]  ;;  %v92_v23 = vmul.f32 %v317_v1, %v21_v17  ;;  %v24_v24 = vld [vmem:[%s897_s0 + $0x50] sm:$0xff] }
   0x5   :  { %v156_v13 = vadd.f32 %v322_v2, %v85_v3  ;;  %v89_v14 = vmul.f32 %v317_v1, %v18_v10  ;;  %v22_v18 = vld [vmem:[%s897_s0 + $0x40] sm:$0xff]  ;;  %v157_v20 = vadd.f32 %v322_v2, %v86_v7  ;;  %v158_v21 = vadd.f32 %v322_v2, %v87_v8  ;;  %v25_v25 = vld [vmem:[%s897_s0 + $0x58] sm:$0xff]  ;;  %v27_v31 = vld [vmem:[%s897_s0 + $0x68] sm:$0xff] }
   0x6   :  { %v159_v22 = vadd.f32 %v322_v2, %v88_v9  ;;  %v26_v26 = vld [vmem:[%s897_s0 + $0x60] sm:$0xff]  ;;  %v161_v28 = vadd.f32 %v322_v2, %v90_v15  ;;  %v162_v29 = vadd.f32 %v322_v2, %v91_v16  ;;  %v93_v30 = vmul.f32 %v317_v1, %v22_v18  ;;  %v28_v32 = vld [vmem:[%s897_s0 + $0x70] sm:$0xff]  ;;  %v29_v33 = vld [vmem:[%s897_s0 + $0x78] sm:$0xff] }
   0x7   :  { %221 = vst.msk [vmem:[%s900_s3] sm:$0xff] %vm220_vm0, %v156_v13  ;;  %v160_v27 = vadd.f32 %v322_v2, %v89_v14  ;;  %222 = vst.msk [vmem:[%s900_s3 + $0x8] sm:$0xff] %vm220_vm0, %v157_v20  ;;  %v163_v34 = vadd.f32 %v322_v2, %v92_v23  ;;  %v94_v35 = vmul.f32 %v317_v1, %v23_v19  ;;  %v30_v38 = vld [vmem:[%s897_s0 + $0x80] sm:$0xff]  ;;  %v31_v43 = vld [vmem:[%s897_s0 + $0x88] sm:$0xff] }
   0x8   :  { %223 = vst.msk [vmem:[%s900_s3 + $0x10] sm:$0xff] %vm220_vm0, %v158_v21  ;;  %224 = vst.msk [vmem:[%s900_s3 + $0x18] sm:$0xff] %vm220_vm0, %v159_v22  ;;  %v95_v36 = vmul.f32 %v317_v1, %v24_v24  ;;  %v96_v37 = vmul.f32 %v317_v1, %v25_v25  ;;  %v164_v39 = vadd.f32 %v322_v2, %v93_v30  ;;  %v32_v44 = vld [vmem:[%s897_s0 + $0x90] sm:$0xff]  ;;  %v33_v45 = vld [vmem:[%s897_s0 + $0x98] sm:$0xff] }
   0x9   :  { %225 = vst.msk [vmem:[%s900_s3 + $0x20] sm:$0xff] %vm220_vm0, %v160_v27  ;;  %226 = vst.msk [vmem:[%s900_s3 + $0x28] sm:$0xff] %vm220_vm0, %v161_v28  ;;  %v97_v40 = vmul.f32 %v317_v1, %v26_v26  ;;  %v98_v41 = vmul.f32 %v317_v1, %v27_v31  ;;  %v99_v42 = vmul.f32 %v317_v1, %v28_v32  ;;  %v34_v50 = vld [vmem:[%s897_s0 + $0xa0] sm:$0xff]  ;;  %v35_v51 = vld [vmem:[%s897_s0 + $0xa8] sm:$0xff] }
   0xa   :  { %227 = vst.msk [vmem:[%s900_s3 + $0x30] sm:$0xff] %vm220_vm0, %v162_v29  ;;  %228 = vst.msk [vmem:[%s900_s3 + $0x38] sm:$0xff] %vm220_vm0, %v163_v34  ;;  %v165_v46 = vadd.f32 %v322_v2, %v94_v35  ;;  %v166_v47 = vadd.f32 %v322_v2, %v95_v36  ;;  %v167_v48 = vadd.f32 %v322_v2, %v96_v37  ;;  %v36_v52 = vld [vmem:[%s897_s0 + $0xb0] sm:$0xff]  ;;  %v37_v57 = vld [vmem:[%s897_s0 + $0xb8] sm:$0xff] }
   0xb   :  { %v100_v49 = vmul.f32 %v317_v1, %v29_v33  ;;  %229 = vst.msk [vmem:[%s900_s3 + $0x40] sm:$0xff] %vm220_vm0, %v164_v39  ;;  %v168_v53 = vadd.f32 %v322_v2, %v97_v40  ;;  %v169_v54 = vadd.f32 %v322_v2, %v98_v41  ;;  %v170_v55 = vadd.f32 %v322_v2, %v99_v42  ;;  %v38_v62 = vld [vmem:[%s897_s0 + $0xc0] sm:$0xff]  ;;  %v39_v5 = vld [vmem:[%s897_s0 + $0xc8] sm:$0xff]  ;;  %v40_v6 = vld [vmem:[%s897_s0 + $0xd0] sm:$0xff] }
   0xc   :  { %v101_v56 = vmul.f32 %v317_v1, %v30_v38  ;;  %230 = vst.msk [vmem:[%s900_s3 + $0x48] sm:$0xff] %vm220_vm0, %v165_v46  ;;  %231 = vst.msk [vmem:[%s900_s3 + $0x50] sm:$0xff] %vm220_vm0, %v166_v47  ;;  %v102_v59 = vmul.f32 %v317_v1, %v31_v43  ;;  %v103_v60 = vmul.f32 %v317_v1, %v32_v44  ;;  %v41_v7 = vld [vmem:[%s897_s0 + $0xd8] sm:$0xff]  ;;  %v42_v12 = vld [vmem:[%s897_s0 + $0xe0] sm:$0xff] }
   0xd   :  { %232 = vst.msk [vmem:[%s900_s3 + $0x58] sm:$0xff] %vm220_vm0, %v167_v48  ;;  %v171_v58 = vadd.f32 %v322_v2, %v100_v49  ;;  %v104_v61 = vmul.f32 %v317_v1, %v33_v45  ;;  %233 = vst.msk [vmem:[%s900_s3 + $0x60] sm:$0xff] %vm220_vm0, %v168_v53  ;;  %v105_v0 = vmul.f32 %v317_v1, %v34_v50  ;;  %v43_v13 = vld [vmem:[%s897_s0 + $0xe8] sm:$0xff]  ;;  %v44_v14 = vld [vmem:[%s897_s0 + $0xf0] sm:$0xff] }
   0xe   :  { %234 = vst.msk [vmem:[%s900_s3 + $0x68] sm:$0xff] %vm220_vm0, %v169_v54  ;;  %235 = vst.msk [vmem:[%s900_s3 + $0x70] sm:$0xff] %vm220_vm0, %v170_v55  ;;  %v172_v63 = vadd.f32 %v322_v2, %v101_v56  ;;  %v106_v3 = vmul.f32 %v317_v1, %v35_v51  ;;  %v107_v4 = vmul.f32 %v317_v1, %v36_v52  ;;  %v45_v19 = vld [vmem:[%s897_s0 + $0xf8] sm:$0xff]  ;;  %v46_v24 = vld [vmem:[%s897_s0 + $0x100] sm:$0xff] }
   0xf   :  { %236 = vst.msk [vmem:[%s900_s3 + $0x78] sm:$0xff] %vm220_vm0, %v171_v58  ;;  %v173_v8 = vadd.f32 %v322_v2, %v102_v59  ;;  %v174_v9 = vadd.f32 %v322_v2, %v103_v60  ;;  %v175_v10 = vadd.f32 %v322_v2, %v104_v61  ;;  %v108_v11 = vmul.f32 %v317_v1, %v37_v57  ;;  %v47_v29 = vld [vmem:[%s897_s0 + $0x108] sm:$0xff]  ;;  %v48_v30 = vld [vmem:[%s897_s0 + $0x110] sm:$0xff]  ;;  %v49_v31 = vld [vmem:[%s897_s0 + $0x118] sm:$0xff] }
  0x10   :  { %237 = vst.msk [vmem:[%s900_s3 + $0x80] sm:$0xff] %vm220_vm0, %v172_v63  ;;  %v176_v15 = vadd.f32 %v322_v2, %v105_v0  ;;  %v177_v16 = vadd.f32 %v322_v2, %v106_v3  ;;  %v178_v17 = vadd.f32 %v322_v2, %v107_v4  ;;  %v109_v18 = vmul.f32 %v317_v1, %v38_v62  ;;  %v50_v36 = vld [vmem:[%s897_s0 + $0x120] sm:$0xff]  ;;  %v51_v37 = vld [vmem:[%s897_s0 + $0x128] sm:$0xff]  ;;  %v52_v38 = vld [vmem:[%s897_s0 + $0x130] sm:$0xff] }
  0x11   :  { %238 = vst.msk [vmem:[%s900_s3 + $0x88] sm:$0xff] %vm220_vm0, %v173_v8  ;;  %239 = vst.msk [vmem:[%s900_s3 + $0x90] sm:$0xff] %vm220_vm0, %v174_v9  ;;  %v179_v20 = vadd.f32 %v322_v2, %v108_v11  ;;  %v110_v21 = vmul.f32 %v317_v1, %v39_v5  ;;  %v111_v22 = vmul.f32 %v317_v1, %v40_v6  ;;  %v53_v43 = vld [vmem:[%s897_s0 + $0x138] sm:$0xff]  ;;  %v54_v48 = vld [vmem:[%s897_s0 + $0x140] sm:$0xff] }
  0x12   :  { %240 = vst.msk [vmem:[%s900_s3 + $0x98] sm:$0xff] %vm220_vm0, %v175_v10  ;;  %v112_v23 = vmul.f32 %v317_v1, %v41_v7  ;;  %241 = vst.msk [vmem:[%s900_s3 + $0xa0] sm:$0xff] %vm220_vm0, %v176_v15  ;;  %v180_v25 = vadd.f32 %v322_v2, %v109_v18  ;;  %v113_v26 = vmul.f32 %v317_v1, %v42_v12  ;;  %v55_v53 = vld [vmem:[%s897_s0 + $0x148] sm:$0xff]  ;;  %v56_v54 = vld [vmem:[%s897_s0 + $0x150] sm:$0xff] }
  0x13   :  { %242 = vst.msk [vmem:[%s900_s3 + $0xa8] sm:$0xff] %vm220_vm0, %v177_v16  ;;  %243 = vst.msk [vmem:[%s900_s3 + $0xb0] sm:$0xff] %vm220_vm0, %v178_v17  ;;  %v114_v27 = vmul.f32 %v317_v1, %v43_v13  ;;  %v115_v28 = vmul.f32 %v317_v1, %v44_v14  ;;  %v181_v32 = vadd.f32 %v322_v2, %v110_v21  ;;  %v57_v55 = vld [vmem:[%s897_s0 + $0x158] sm:$0xff]  ;;  %v58_v60 = vld [vmem:[%s897_s0 + $0x160] sm:$0xff] }
  0x14   :  { %244 = vst.msk [vmem:[%s900_s3 + $0xb8] sm:$0xff] %vm220_vm0, %v179_v20  ;;  %v182_v33 = vadd.f32 %v322_v2, %v111_v22  ;;  %v183_v34 = vadd.f32 %v322_v2, %v112_v23  ;;  %v116_v35 = vmul.f32 %v317_v1, %v45_v19  ;;  %245 = vst.msk [vmem:[%s900_s3 + $0xc0] sm:$0xff] %vm220_vm0, %v180_v25  ;;  %v59_v61 = vld [vmem:[%s897_s0 + $0x168] sm:$0xff]  ;;  %v60_v62 = vld [vmem:[%s897_s0 + $0x170] sm:$0xff] }
  0x15   :  { %v184_v39 = vadd.f32 %v322_v2, %v113_v26  ;;  %v185_v40 = vadd.f32 %v322_v2, %v114_v27  ;;  %v186_v41 = vadd.f32 %v322_v2, %v115_v28  ;;  %v117_v42 = vmul.f32 %v317_v1, %v46_v24  ;;  %246 = vst.msk [vmem:[%s900_s3 + $0xc8] sm:$0xff] %vm220_vm0, %v181_v32  ;;  %v61_v5 = vld [vmem:[%s897_s0 + $0x178] sm:$0xff]  ;;  %v62_v10 = vld [vmem:[%s897_s0 + $0x180] sm:$0xff]  ;;  %v63_v15 = vld [vmem:[%s897_s0 + $0x188] sm:$0xff] }
  0x16   :  { %247 = vst.msk [vmem:[%s900_s3 + $0xd0] sm:$0xff] %vm220_vm0, %v182_v33  ;;  %248 = vst.msk [vmem:[%s900_s3 + $0xd8] sm:$0xff] %vm220_vm0, %v183_v34  ;;  %v187_v44 = vadd.f32 %v322_v2, %v116_v35  ;;  %v118_v45 = vmul.f32 %v317_v1, %v47_v29  ;;  %v119_v46 = vmul.f32 %v317_v1, %v48_v30  ;;  %v64_v16 = vld [vmem:[%s897_s0 + $0x190] sm:$0xff]  ;;  %v65_v17 = vld [vmem:[%s897_s0 + $0x198] sm:$0xff] }
  0x17   :  { %v120_v47 = vmul.f32 %v317_v1, %v49_v31  ;;  %249 = vst.msk [vmem:[%s900_s3 + $0xe0] sm:$0xff] %vm220_vm0, %v184_v39  ;;  %250 = vst.msk [vmem:[%s900_s3 + $0xe8] sm:$0xff] %vm220_vm0, %v185_v40  ;;  %v188_v49 = vadd.f32 %v322_v2, %v117_v42  ;;  %v121_v50 = vmul.f32 %v317_v1, %v50_v36  ;;  %v66_v22 = vld [vmem:[%s897_s0 + $0x1a0] sm:$0xff]  ;;  %v67_v23 = vld [vmem:[%s897_s0 + $0x1a8] sm:$0xff] }
  0x18   :  { %251 = vst.msk [vmem:[%s900_s3 + $0xf0] sm:$0xff] %vm220_vm0, %v186_v41  ;;  %v122_v51 = vmul.f32 %v317_v1, %v51_v37  ;;  %v123_v52 = vmul.f32 %v317_v1, %v52_v38  ;;  %252 = vst.msk [vmem:[%s900_s3 + $0xf8] sm:$0xff] %vm220_vm0, %v187_v44  ;;  %v189_v56 = vadd.f32 %v322_v2, %v118_v45  ;;  %v68_v24 = vld [vmem:[%s897_s0 + $0x1b0] sm:$0xff]  ;;  %v69_v29 = vld [vmem:[%s897_s0 + $0x1b8] sm:$0xff] }
  0x19   :  { %v190_v57 = vadd.f32 %v322_v2, %v119_v46  ;;  %v191_v58 = vadd.f32 %v322_v2, %v120_v47  ;;  %v124_v59 = vmul.f32 %v317_v1, %v53_v43  ;;  %253 = vst.msk [vmem:[%s900_s3 + $0x100] sm:$0xff] %vm220_vm0, %v188_v49  ;;  %v192_v63 = vadd.f32 %v322_v2, %v121_v50  ;;  %v70_v34 = vld [vmem:[%s897_s0 + $0x1c0] sm:$0xff]  ;;  %v71_v39 = vld [vmem:[%s897_s0 + $0x1c8] sm:$0xff]  ;;  %v72_v40 = vld [vmem:[%s897_s0 + $0x1d0] sm:$0xff] }
  0x1a   :  { %v193_v0 = vadd.f32 %v322_v2, %v122_v51  ;;  %v194_v3 = vadd.f32 %v322_v2, %v123_v52  ;;  %v125_v4 = vmul.f32 %v317_v1, %v54_v48  ;;  %254 = vst.msk [vmem:[%s900_s3 + $0x108] sm:$0xff] %vm220_vm0, %v189_v56  ;;  %v126_v7 = vmul.f32 %v317_v1, %v55_v53  ;;  %v73_v41 = vld [vmem:[%s897_s0 + $0x1d8] sm:$0xff]  ;;  %v74_v46 = vld [vmem:[%s897_s0 + $0x1e0] sm:$0xff]  ;;  %v75_v47 = vld [vmem:[%s897_s0 + $0x1e8] sm:$0xff] }
  0x1b   :  { %255 = vst.msk [vmem:[%s900_s3 + $0x110] sm:$0xff] %vm220_vm0, %v190_v57  ;;  %256 = vst.msk [vmem:[%s900_s3 + $0x118] sm:$0xff] %vm220_vm0, %v191_v58  ;;  %v195_v6 = vadd.f32 %v322_v2, %v124_v59  ;;  %v127_v8 = vmul.f32 %v317_v1, %v56_v54  ;;  %v128_v9 = vmul.f32 %v317_v1, %v57_v55  ;;  %v76_v48 = vld [vmem:[%s897_s0 + $0x1f0] sm:$0xff]  ;;  %v77_v53 = vld [vmem:[%s897_s0 + $0x1f8] sm:$0xff] }
  0x1c   :  { %257 = vst.msk [vmem:[%s900_s3 + $0x120] sm:$0xff] %vm220_vm0, %v192_v63  ;;  %258 = vst.msk [vmem:[%s900_s3 + $0x128] sm:$0xff] %vm220_vm0, %v193_v0  ;;  %v196_v11 = vadd.f32 %v322_v2, %v125_v4  ;;  %v129_v12 = vmul.f32 %v317_v1, %v58_v60  ;;  %v130_v13 = vmul.f32 %v317_v1, %v59_v61 }
  0x1d   :  { %259 = vst.msk [vmem:[%s900_s3 + $0x130] sm:$0xff] %vm220_vm0, %v194_v3  ;;  %v131_v14 = vmul.f32 %v317_v1, %v60_v62  ;;  %260 = vst.msk [vmem:[%s900_s3 + $0x138] sm:$0xff] %vm220_vm0, %v195_v6  ;;  %v197_v18 = vadd.f32 %v322_v2, %v126_v7  ;;  %v198_v19 = vadd.f32 %v322_v2, %v127_v8 }
  0x1e   :  { %v199_v20 = vadd.f32 %v322_v2, %v128_v9  ;;  %v132_v21 = vmul.f32 %v317_v1, %v61_v5  ;;  %261 = vst.msk [vmem:[%s900_s3 + $0x140] sm:$0xff] %vm220_vm0, %v196_v11  ;;  %v200_v25 = vadd.f32 %v322_v2, %v129_v12  ;;  %v201_v26 = vadd.f32 %v322_v2, %v130_v13 }
  0x1f   :  { %v202_v27 = vadd.f32 %v322_v2, %v131_v14  ;;  %v133_v28 = vmul.f32 %v317_v1, %v62_v10  ;;  %262 = vst.msk [vmem:[%s900_s3 + $0x148] sm:$0xff] %vm220_vm0, %v197_v18  ;;  %263 = vst.msk [vmem:[%s900_s3 + $0x150] sm:$0xff] %vm220_vm0, %v198_v19  ;;  %v134_v31 = vmul.f32 %v317_v1, %v63_v15 }
  0x20   :  { %264 = vst.msk [vmem:[%s900_s3 + $0x158] sm:$0xff] %vm220_vm0, %v199_v20  ;;  %v203_v30 = vadd.f32 %v322_v2, %v132_v21  ;;  %v135_v32 = vmul.f32 %v317_v1, %v64_v16  ;;  %v136_v33 = vmul.f32 %v317_v1, %v65_v17  ;;  %265 = vst.msk [vmem:[%s900_s3 + $0x160] sm:$0xff] %vm220_vm0, %v200_v25 }
  0x21   :  { %266 = vst.msk [vmem:[%s900_s3 + $0x168] sm:$0xff] %vm220_vm0, %v201_v26  ;;  %267 = vst.msk [vmem:[%s900_s3 + $0x170] sm:$0xff] %vm220_vm0, %v202_v27  ;;  %v204_v35 = vadd.f32 %v322_v2, %v133_v28  ;;  %v137_v36 = vmul.f32 %v317_v1, %v66_v22  ;;  %v138_v37 = vmul.f32 %v317_v1, %v67_v23 }
  0x22   :  { %v139_v38 = vmul.f32 %v317_v1, %v68_v24  ;;  %268 = vst.msk [vmem:[%s900_s3 + $0x178] sm:$0xff] %vm220_vm0, %v203_v30  ;;  %v205_v42 = vadd.f32 %v322_v2, %v134_v31  ;;  %v206_v43 = vadd.f32 %v322_v2, %v135_v32  ;;  %v207_v44 = vadd.f32 %v322_v2, %v136_v33 }
  0x23   :  { %v140_v45 = vmul.f32 %v317_v1, %v69_v29  ;;  %269 = vst.msk [vmem:[%s900_s3 + $0x180] sm:$0xff] %vm220_vm0, %v204_v35  ;;  %v208_v49 = vadd.f32 %v322_v2, %v137_v36  ;;  %v209_v50 = vadd.f32 %v322_v2, %v138_v37  ;;  %v141_v52 = vmul.f32 %v317_v1, %v70_v34 }
  0x24   :  { %v210_v51 = vadd.f32 %v322_v2, %v139_v38  ;;  %270 = vst.msk [vmem:[%s900_s3 + $0x188] sm:$0xff] %vm220_vm0, %v205_v42  ;;  %271 = vst.msk [vmem:[%s900_s3 + $0x190] sm:$0xff] %vm220_vm0, %v206_v43  ;;  %v142_v55 = vmul.f32 %v317_v1, %v71_v39  ;;  %v143_v56 = vmul.f32 %v317_v1, %v72_v40 }
  0x25   :  { %272 = vst.msk [vmem:[%s900_s3 + $0x198] sm:$0xff] %vm220_vm0, %v207_v44  ;;  %v211_v54 = vadd.f32 %v322_v2, %v140_v45  ;;  %v144_v57 = vmul.f32 %v317_v1, %v73_v41  ;;  %273 = vst.msk [vmem:[%s900_s3 + $0x1a0] sm:$0xff] %vm220_vm0, %v208_v49  ;;  %v212_v58 = vadd.f32 %v322_v2, %v141_v52 }
  0x26   :  { %274 = vst.msk [vmem:[%s900_s3 + $0x1a8] sm:$0xff] %vm220_vm0, %v209_v50  ;;  %275 = vst.msk [vmem:[%s900_s3 + $0x1b0] sm:$0xff] %vm220_vm0, %v210_v51  ;;  %v145_v59 = vmul.f32 %v317_v1, %v74_v46  ;;  %v146_v60 = vmul.f32 %v317_v1, %v75_v47  ;;  %v147_v61 = vmul.f32 %v317_v1, %v76_v48 }
  0x27   :  { %276 = vst.msk [vmem:[%s900_s3 + $0x1b8] sm:$0xff] %vm220_vm0, %v211_v54  ;;  %v213_v62 = vadd.f32 %v322_v2, %v142_v55  ;;  %v214_v63 = vadd.f32 %v322_v2, %v143_v56  ;;  %v215_v0 = vadd.f32 %v322_v2, %v144_v57  ;;  %v148_v3 = vmul.f32 %v317_v1, %v77_v53 }
  0x28   :  { %277 = vst.msk [vmem:[%s900_s3 + $0x1c0] sm:$0xff] %vm220_vm0, %v212_v58  ;;  %v216_v4 = vadd.f32 %v322_v2, %v145_v59  ;;  %v217_v5 = vadd.f32 %v322_v2, %v146_v60  ;;  %v218_v6 = vadd.f32 %v322_v2, %v147_v61 }
  0x29   :  { %278 = vst.msk [vmem:[%s900_s3 + $0x1c8] sm:$0xff] %vm220_vm0, %v213_v62  ;;  %279 = vst.msk [vmem:[%s900_s3 + $0x1d0] sm:$0xff] %vm220_vm0, %v214_v63  ;;  %v219_v1 = vadd.f32 %v322_v2, %v148_v3 }
  0x2a   :  { %280 = vst.msk [vmem:[%s900_s3 + $0x1d8] sm:$0xff] %vm220_vm0, %v215_v0  ;;  %281 = vst.msk [vmem:[%s900_s3 + $0x1e0] sm:$0xff] %vm220_vm0, %v216_v4 }
  0x2b   :  { %282 = vst.msk [vmem:[%s900_s3 + $0x1e8] sm:$0xff] %vm220_vm0, %v217_v5  ;;  %283 = vst.msk [vmem:[%s900_s3 + $0x1f0] sm:$0xff] %vm220_vm0, %v218_v6 }
  0x2c   :  { %284 = vst.msk [vmem:[%s900_s3 + $0x1f8] sm:$0xff] %vm220_vm0, %v219_v1 }

// kernel: unet_innermost_block.6
= control target key start
LH: loop header
LB: loop body
LE: loop exit
PB: predicated region body
PF: predicated region fallthrough
CT: control target
= control target key end

     0   :  { %vm14_vm0 = vcmask 24576   ;;  %vm82_vm1 = vcmask 31744   ;;  %v428_v0 = vmov 0.0   ;;  %s1318_s0 = inlined_call_operand.vmem [shape: f32[512,4], index: 0, kind: input, shape index: {}]   ;;  %s1319_s1 = inlined_call_operand.vmem [shape: f32[1,4], index: 1, kind: output, shape index: {0}]   ;;  %s1320_s2 = inlined_call_operand.vmem [shape: f32[1,4], index: 2, kind: output, shape index: {1}]  }
   0x1   :  { %15 = vst.msk [vmem:[%s1319_s1] sm:$0x1] %vm14_vm0, %v428_v0  ;;  %16 = vst.msk [vmem:[%s1320_s2] sm:$0x1] %vm14_vm0, %v428_v0  ;;  %v455_v1 = vld [vmem:[%s1318_s0] sm:$0xff]  ;;  %v460_v2 = vld [vmem:[%s1318_s0 + $0x8] sm:$0xff] }
   0x2   :  { %v465_v3 = vld [vmem:[%s1318_s0 + $0x10] sm:$0xff]  ;;  %v83_v4 = vsel %vm82_vm1, %v455_v1, 0.0  ;;  %v84_v5 = vsel %vm82_vm1, %v460_v2, 0.0  ;;  %v476_v7 = vld [vmem:[%s1318_s0 + $0x18] sm:$0xff]  ;;  %v483_v10 = vld [vmem:[%s1318_s0 + $0x20] sm:$0xff] }
   0x3   :  { %v86_v6 = vsel %vm82_vm1, %v465_v3, 0.0  ;;  %v85_v8 = vadd.f32 %v84_v5, %v83_v4  ;;  %v88_v9 = vsel %vm82_vm1, %v476_v7, 0.0  ;;  %v90_v12 = vsel %vm82_vm1, %v483_v10, 0.0  ;;  %v490_v13 = vld [vmem:[%s1318_s0 + $0x28] sm:$0xff]  ;;  %v497_v16 = vld [vmem:[%s1318_s0 + $0x30] sm:$0xff]  ;;  %v502_v18 = vld [vmem:[%s1318_s0 + $0x38] sm:$0xff] }
   0x4   :  { %v92_v15 = vsel %vm82_vm1, %v490_v13, 0.0  ;;  %v507_v19 = vld [vmem:[%s1318_s0 + $0x40] sm:$0xff]  ;;  %v94_v20 = vsel %vm82_vm1, %v497_v16, 0.0  ;;  %v514_v21 = vld [vmem:[%s1318_s0 + $0x48] sm:$0xff]  ;;  %v519_v22 = vld [vmem:[%s1318_s0 + $0x50] sm:$0xff]  ;;  %v96_v25 = vsel %vm82_vm1, %v502_v18, 0.0 }
   0x5   :  { %v87_v11 = vadd.f32 %v86_v6, %v85_v8  ;;  %v524_v23 = vld [vmem:[%s1318_s0 + $0x58] sm:$0xff]  ;;  %v98_v26 = vsel %vm82_vm1, %v507_v19, 0.0  ;;  %v533_v27 = vld [vmem:[%s1318_s0 + $0x108] sm:$0xff]  ;;  %v538_v28 = vld [vmem:[%s1318_s0 + $0x110] sm:$0xff]  ;;  %v100_v30 = vsel %vm82_vm1, %v514_v21, 0.0  ;;  %v102_v31 = vsel %vm82_vm1, %v519_v22, 0.0 }
   0x6   :  { %v543_v29 = vld [vmem:[%s1318_s0 + $0x118] sm:$0xff]  ;;  %v551_v32 = vsel %vm82_vm1, %v524_v23, 0.0  ;;  %v556_v33 = vld [vmem:[%s1318_s0 + $0x120] sm:$0xff]  ;;  %v561_v34 = vld [vmem:[%s1318_s0 + $0x128] sm:$0xff]  ;;  %v570_v37 = vsel %vm82_vm1, %v533_v27, 0.0  ;;  %v574_v38 = vsel %vm82_vm1, %v538_v28, 0.0 }
   0x7   :  { %v89_v14 = vadd.f32 %v88_v9, %v87_v11  ;;  %v566_v35 = vld [vmem:[%s1318_s0 + $0x130] sm:$0xff]  ;;  %1339 = vst [vmem:[#allocation2_spill] sm:$0xff] %v570_v37  ;;  %1340 = vst [vmem:[#allocation3_spill] sm:$0xff] %v574_v38  ;;  %v578_v39 = vsel %vm82_vm1, %v543_v29, 0.0  ;;  %v583_v40 = vld [vmem:[%s1318_s0 + $0x138] sm:$0xff]  ;;  %v597_v43 = vsel %vm82_vm1, %v556_v33, 0.0  ;;  %v222_v37 = vmul.f32 %v465_v3, %v465_v3 }
   0x8   :  { %1341 = vst [vmem:[#allocation4_spill] sm:$0xff] %v578_v39  ;;  %v588_v41 = vld [vmem:[%s1318_s0 + $0x140] sm:$0xff]  ;;  %v593_v42 = vld [vmem:[%s1318_s0 + $0x148] sm:$0xff]  ;;  %1342 = vst [vmem:[#allocation5_spill] sm:$0xff] %v597_v43  ;;  %v601_v44 = vsel %vm82_vm1, %v561_v34, 0.0  ;;  %v605_v45 = vsel %vm82_vm1, %v566_v35, 0.0 }
   0x9   :  { %v91_v17 = vadd.f32 %v90_v12, %v89_v14  ;;  %1343 = vst [vmem:[#allocation6_spill] sm:$0xff] %v601_v44  ;;  %1344 = vst [vmem:[#allocation7_spill] sm:$0xff] %v605_v45  ;;  %v610_v46 = vld [vmem:[%s1318_s0 + $0x150] sm:$0xff]  ;;  %v615_v47 = vld [vmem:[%s1318_s0 + $0x158] sm:$0xff]  ;;  %v624_v50 = vsel %vm82_vm1, %v583_v40, 0.0  ;;  %v628_v51 = vsel %vm82_vm1, %v588_v41, 0.0 }
   0xa   :  { %v620_v48 = vld [vmem:[%s1318_s0 + $0x160] sm:$0xff]  ;;  %1345 = vst [vmem:[#allocation8_spill] sm:$0xff] %v624_v50  ;;  %1346 = vst [vmem:[#allocation9_spill] sm:$0xff] %v628_v51  ;;  %v632_v52 = vsel %vm82_vm1, %v593_v42, 0.0  ;;  %v637_v53 = vld [vmem:[%s1318_s0 + $0x168] sm:$0xff]  ;;  %v651_v56 = vsel %vm82_vm1, %v610_v46, 0.0 }
   0xb   :  { %v93_v24 = vadd.f32 %v92_v15, %v91_v17  ;;  %1347 = vst [vmem:[#allocation10_spill] sm:$0xff] %v632_v52  ;;  %v642_v54 = vld [vmem:[%s1318_s0 + $0x170] sm:$0xff]  ;;  %v647_v55 = vld [vmem:[%s1318_s0 + $0x178] sm:$0xff]  ;;  %1348 = vst [vmem:[#allocation11_spill] sm:$0xff] %v651_v56  ;;  %v655_v57 = vsel %vm82_vm1, %v615_v47, 0.0  ;;  %v659_v58 = vsel %vm82_vm1, %v620_v48, 0.0 }
   0xc   :  { %1349 = vst [vmem:[#allocation12_spill] sm:$0xff] %v655_v57  ;;  %1350 = vst [vmem:[#allocation13_spill] sm:$0xff] %v659_v58  ;;  %v664_v59 = vld [vmem:[%s1318_s0 + $0x180] sm:$0xff]  ;;  %v669_v60 = vld [vmem:[%s1318_s0 + $0x188] sm:$0xff]  ;;  %v678_v63 = vsel %vm82_vm1, %v637_v53, 0.0  ;;  %v682_v0 = vsel %vm82_vm1, %v642_v54, 0.0 }
   0xd   :  { %v95_v36 = vadd.f32 %v94_v20, %v93_v24  ;;  %v674_v61 = vld [vmem:[%s1318_s0 + $0x190] sm:$0xff]  ;;  %1351 = vst [vmem:[#allocation14_spill] sm:$0xff] %v678_v63  ;;  %1352 = vst [vmem:[#allocation15_spill] sm:$0xff] %v682_v0  ;;  %v686_v4 = vsel %vm82_vm1, %v647_v55, 0.0  ;;  %v691_v5 = vld [vmem:[%s1318_s0 + $0x198] sm:$0xff]  ;;  %v705_v9 = vsel %vm82_vm1, %v664_v59, 0.0 }
   0xe   :  { %1353 = vst [vmem:[#allocation16_spill] sm:$0xff] %v686_v4  ;;  %v696_v6 = vld [vmem:[%s1318_s0 + $0x1a0] sm:$0xff]  ;;  %v701_v8 = vld [vmem:[%s1318_s0 + $0x1a8] sm:$0xff]  ;;  %1354 = vst [vmem:[#allocation17_spill] sm:$0xff] %v705_v9  ;;  %v709_v11 = vsel %vm82_vm1, %v669_v60, 0.0  ;;  %v713_v12 = vsel %vm82_vm1, %v674_v61, 0.0 }
   0xf   :  { %v97_v49 = vadd.f32 %v96_v25, %v95_v36  ;;  %1355 = vst [vmem:[#allocation18_spill] sm:$0xff] %v709_v11  ;;  %1356 = vst [vmem:[#allocation19_spill] sm:$0xff] %v713_v12  ;;  %v718_v14 = vld [vmem:[%s1318_s0 + $0x60] sm:$0xff]  ;;  %v723_v15 = vld [vmem:[%s1318_s0 + $0x1b0] sm:$0xff]  ;;  %v737_v25 = vsel %vm82_vm1, %v691_v5, 0.0  ;;  %v745_v36 = vsel %vm82_vm1, %v701_v8, 0.0 }
  0x10   :  { %v728_v17 = vld [vmem:[%s1318_s0 + $0x1b8] sm:$0xff]  ;;  %v733_v20 = vld [vmem:[%s1318_s0 + $0x1c0] sm:$0xff]  ;;  %1357 = vst [vmem:[#allocation20_spill] sm:$0xff] %v737_v25  ;;  %1359 = vst [vmem:[#allocation22_spill] sm:$0xff] %v745_v36 }
  0x11   :  { %v99_v62 = vadd.f32 %v98_v26, %v97_v49  ;;  %v741_v26 = vsel %vm82_vm1, %v696_v6, 0.0  ;;  %v750_v49 = vld [vmem:[%s1318_s0 + $0x1c8] sm:$0xff]  ;;  %v768_v36 = vsel %vm82_vm1, %v728_v17, 0.0  ;;  %v772_v25 = vsel %vm82_vm1, %v733_v20, 0.0  ;;  %v777_v12 = vld [vmem:[%s1318_s0 + $0x1e0] sm:$0xff]  ;;  %v804_v0 = vld [vmem:[%s1318_s0 + $0x1f8] sm:$0xff] }
  0x12   :  { %1358 = vst [vmem:[#allocation21_spill] sm:$0xff] %v741_v26  ;;  %v764_v26 = vsel %vm82_vm1, %v723_v15, 0.0  ;;  %1361 = vst [vmem:[#allocation24_spill] sm:$0xff] %v768_v36  ;;  %v782_v11 = vld [vmem:[%s1318_s0 + $0x1e8] sm:$0xff]  ;;  %v791_v9 = vsel %vm82_vm1, %v750_v49, 0.0  ;;  %v826_v58 = vsel %vm82_vm1, %v804_v0, 0.0 }
  0x13   :  { %v101_v24 = vadd.f32 %v100_v30, %v99_v62  ;;  %v755_v30 = vld [vmem:[%s1318_s0 + $0x1d0] sm:$0xff]  ;;  %v760_v62 = vld [vmem:[%s1318_s0 + $0x1d8] sm:$0xff]  ;;  %1360 = vst [vmem:[#allocation23_spill] sm:$0xff] %v764_v26  ;;  %1362 = vst [vmem:[#allocation25_spill] sm:$0xff] %v772_v25 }
  0x14   :  { %v787_v26 = vld [vmem:[%s1318_s0 + $0x1f0] sm:$0xff]  ;;  %1364 = vst [vmem:[#allocation27_spill] sm:$0xff] %v791_v9  ;;  %v795_v25 = vsel %vm82_vm1, %v755_v30, 0.0  ;;  %v799_v4 = vsel %vm82_vm1, %v760_v62, 0.0  ;;  %1367 = vst [vmem:[#allocation30_spill] sm:$0xff] %v804_v0  ;;  %v814_v9 = vsel %vm82_vm1, %v782_v11, 0.0 }
  0x15   :  { %1363 = vst [vmem:[#allocation26_spill] sm:$0xff] %v787_v26  ;;  %v103_v36 = vadd.f32 %v102_v31, %v101_v24  ;;  %1365 = vst [vmem:[#allocation28_spill] sm:$0xff] %v795_v25  ;;  %v106_v31 = vsel %vm82_vm1, %v718_v14, 0.0  ;;  %v810_v24 = vsel %vm82_vm1, %v777_v12, 0.0  ;;  %v818_v25 = vsel %vm82_vm1, %v787_v26, 0.0  ;;  %v855_v56 = vld [vmem:[%s1318_s0 + $0x90] sm:$0xff] }
  0x16   :  { %1366 = vst [vmem:[#allocation29_spill] sm:$0xff] %v799_v4  ;;  %1368 = vst [vmem:[#allocation31_spill] sm:$0xff] %v810_v24  ;;  %v30_v4 = vld [vmem:[%s1318_s0 + $0x68] sm:$0xff]  ;;  %v860_v52 = vld [vmem:[%s1318_s0 + $0x98] sm:$0xff] }
  0x17   :  { %1369 = vst [vmem:[#allocation32_spill] sm:$0xff] %v814_v9  ;;  %1370 = vst [vmem:[#allocation33_spill] sm:$0xff] %v818_v25  ;;  %v105_v63 = vadd.f32 %v551_v32, %v103_v36  ;;  %v108_v24 = vsel %vm82_vm1, %v30_v4, 0.0  ;;  %v31_v9 = vld [vmem:[%s1318_s0 + $0x70] sm:$0xff]  ;;  %v835_v25 = vld [vmem:[%s1318_s0 + $0x78] sm:$0xff]  ;;  %v120_v39 = vsel %vm82_vm1, %v860_v52, 0.0 }
  0x18   :  { %1371 = vst [vmem:[#allocation34_spill] sm:$0xff] %v826_v58  ;;  %1372 = vst [vmem:[#allocation35_spill] sm:$0xff] %v835_v25  ;;  %v840_v32 = vld [vmem:[%s1318_s0 + $0x80] sm:$0xff]  ;;  %v845_v36 = vld [vmem:[%s1318_s0 + $0x88] sm:$0xff]  ;;  %v110_v58 = vsel %vm82_vm1, %v31_v9, 0.0 }
  0x19   :  { %v107_v57 = vadd.f32 %v106_v31, %v105_v63  ;;  %1373 = vst [vmem:[#allocation36_spill] sm:$0xff] %v840_v32  ;;  %1374 = vst [vmem:[#allocation37_spill] sm:$0xff] %v845_v36  ;;  %v220_v63 = vmul.f32 %v455_v1, %v455_v1  ;;  %v221_v31 = vmul.f32 %v460_v2, %v460_v2  ;;  %v865_v51 = vld [vmem:[%s1318_s0 + $0xa0] sm:$0xff]  ;;  %v112_v1 = vsel %vm82_vm1, %v835_v25, 0.0  ;;  %v876_v44 = vld [vmem:[%s1318_s0 + $0xa8] sm:$0xff] }
  0x1a   :  { %1375 = vst [vmem:[#allocation38_spill] sm:$0xff] %v855_v56  ;;  %1376 = vst [vmem:[#allocation39_spill] sm:$0xff] %v860_v52  ;;  %v114_v2 = vsel %vm82_vm1, %v840_v32, 0.0  ;;  %v116_v45 = vsel %vm82_vm1, %v845_v36, 0.0  ;;  %v881_v43 = vld [vmem:[%s1318_s0 + $0xb0] sm:$0xff]  ;;  %v122_v38 = vsel %vm82_vm1, %v865_v51, 0.0  ;;  %v223_v25 = vmul.f32 %v476_v7, %v476_v7 }
  0x1b   :  { %1377 = vst [vmem:[#allocation40_spill] sm:$0xff] %v865_v51  ;;  %v109_v50 = vadd.f32 %v108_v24, %v107_v57  ;;  %1378 = vst [vmem:[#allocation41_spill] sm:$0xff] %v876_v44  ;;  %v886_v57 = vld [vmem:[%s1318_s0 + $0xb8] sm:$0xff]  ;;  %v118_v24 = vsel %vm82_vm1, %v855_v56, 0.0  ;;  %v899_v36 = vld [vmem:[%s1318_s0 + $0xc0] sm:$0xff]  ;;  %v124_v51 = vsel %vm82_vm1, %v876_v44, 0.0 }
  0x1c   :  { %1379 = vst [vmem:[#allocation42_spill] sm:$0xff] %v881_v43  ;;  %1380 = vst [vmem:[#allocation43_spill] sm:$0xff] %v886_v57  ;;  %v904_v32 = vld [vmem:[%s1318_s0 + $0xc8] sm:$0xff]  ;;  %v909_v52 = vld [vmem:[%s1318_s0 + $0xd0] sm:$0xff]  ;;  %v915_v3 = vsel %vm82_vm1, %v881_v43, 0.0 }
  0x1d   :  { %1381 = vst [vmem:[#allocation44_spill] sm:$0xff] %v899_v36  ;;  %1382 = vst [vmem:[#allocation45_spill] sm:$0xff] %v904_v32  ;;  %v111_v56 = vadd.f32 %v110_v58, %v109_v50  ;;  %v922_v0 = vld [vmem:[%s1318_s0 + $0xd8] sm:$0xff]  ;;  %v927_v26 = vld [vmem:[%s1318_s0 + $0xe0] sm:$0xff]  ;;  %v931_v50 = vsel %vm82_vm1, %v886_v57, 0.0  ;;  %v935_v58 = vsel %vm82_vm1, %v899_v36, 0.0 }
  0x1e   :  { %1383 = vst [vmem:[#allocation46_spill] sm:$0xff] %v909_v52  ;;  %1384 = vst [vmem:[#allocation47_spill] sm:$0xff] %v922_v0  ;;  %v939_v7 = vsel %vm82_vm1, %v904_v32, 0.0  ;;  %v943_v43 = vsel %vm82_vm1, %v909_v52, 0.0  ;;  %v948_v44 = vld [vmem:[%s1318_s0 + $0xe8] sm:$0xff]  ;;  %v953_v57 = vld [vmem:[%s1318_s0 + $0xf0] sm:$0xff]  ;;  %v224_v52 = vmul.f32 %v483_v10, %v483_v10  ;;  %v228_v10 = vmul.f32 %v507_v19, %v507_v19 }
  0x1f   :  { %1385 = vst [vmem:[#allocation48_spill] sm:$0xff] %v927_v26  ;;  %1386 = vst [vmem:[#allocation49_spill] sm:$0xff] %v935_v58  ;;  %v113_v36 = vadd.f32 %v112_v1, %v111_v56  ;;  %v957_v58 = vsel %vm82_vm1, %v922_v0, 0.0  ;;  %v961_v32 = vsel %vm82_vm1, %v927_v26, 0.0  ;;  %v225_v56 = vmul.f32 %v490_v13, %v490_v13 }
  0x20   :  { %1387 = vst [vmem:[#allocation50_spill] sm:$0xff] %v939_v7  ;;  %1388 = vst [vmem:[#allocation51_spill] sm:$0xff] %v943_v43  ;;  %v967_v43 = vsel %vm82_vm1, %v948_v44, 0.0  ;;  %v971_v7 = vsel %vm82_vm1, %v953_v57, 0.0  ;;  %v226_v1 = vmul.f32 %v497_v16, %v497_v16  ;;  %v227_v26 = vmul.f32 %v502_v18, %v502_v18 }
  0x21   :  { %1389 = vst [vmem:[#allocation52_spill] sm:$0xff] %v948_v44  ;;  %1390 = vst [vmem:[#allocation53_spill] sm:$0xff] %v953_v57  ;;  %v115_v0 = vadd.f32 %v114_v2, %v113_v36  ;;  %v229_v44 = vmul.f32 %v514_v21, %v514_v21  ;;  %v230_v57 = vmul.f32 %v519_v22, %v519_v22 }
  0x22   :  { %1391 = vst [vmem:[#allocation54_spill] sm:$0xff] %v971_v7  ;;  %v231_v7 = vmul.f32 %v524_v23, %v524_v23  ;;  %v232_v13 = vmul.f32 %v718_v14, %v718_v14  ;;  %v989_v16 = vmul.f32 %v30_v4, %v30_v4  ;;  %v991_v2 = vmul.f32 %v31_v9, %v31_v9 }
  0x23   :  { %v117_v36 = vadd.f32 %v116_v45, %v115_v0  ;;  %v253_v18 = vmul.f32 %v533_v27, %v533_v27  ;;  %v254_v19 = vmul.f32 %v538_v28, %v538_v28  ;;  %v255_v21 = vmul.f32 %v543_v29, %v543_v29 }
  0x24   :  { %v256_v22 = vmul.f32 %v556_v33, %v556_v33  ;;  %v257_v23 = vmul.f32 %v561_v34, %v561_v34  ;;  %v258_v45 = vmul.f32 %v566_v35, %v566_v35  ;;  %v259_v4 = vmul.f32 %v583_v40, %v583_v40 }
  0x25   :  { %v119_v0 = vadd.f32 %v118_v24, %v117_v36  ;;  %v260_v27 = vmul.f32 %v588_v41, %v588_v41  ;;  %v261_v28 = vmul.f32 %v593_v42, %v593_v42  ;;  %v262_v29 = vmul.f32 %v610_v46, %v610_v46 }
  0x26   :  { %v263_v33 = vmul.f32 %v615_v47, %v615_v47  ;;  %v284_v34 = vsel %vm82_vm1, %v220_v63, 0.0  ;;  %v285_v35 = vsel %vm82_vm1, %v221_v31, 0.0  ;;  %v264_v40 = vmul.f32 %v620_v48, %v620_v48 }
  0x27   :  { %v121_v9 = vadd.f32 %v120_v39, %v119_v0  ;;  %v286_v14 = vadd.f32 %v285_v35, %v284_v34  ;;  %v287_v41 = vsel %vm82_vm1, %v222_v37, 0.0  ;;  %v265_v42 = vmul.f32 %v637_v53, %v637_v53  ;;  %v1392_v0 = vld [vmem:[#allocation26_spill] sm:$0xff] }
  0x28   :  { %v266_v46 = vmul.f32 %v642_v54, %v642_v54  ;;  %v267_v47 = vmul.f32 %v647_v55, %v647_v55  ;;  %v289_v63 = vsel %vm82_vm1, %v223_v25, 0.0  ;;  %v268_v39 = vmul.f32 %v664_v59, %v664_v59  ;;  %v1393_v34 = vld [vmem:[#allocation30_spill] sm:$0xff] }
  0x29   :  { %v123_v24 = vadd.f32 %v122_v38, %v121_v9  ;;  %v269_v48 = vmul.f32 %v669_v60, %v669_v60  ;;  %v288_v31 = vadd.f32 %v287_v41, %v286_v14  ;;  %v270_v37 = vmul.f32 %v674_v61, %v674_v61  ;;  %v1394_v41 = vld [vmem:[#allocation49_spill] sm:$0xff] }
  0x2a   :  { %v271_v53 = vmul.f32 %v691_v5, %v691_v5  ;;  %v272_v54 = vmul.f32 %v696_v6, %v696_v6  ;;  %v291_v55 = vsel %vm82_vm1, %v224_v52, 0.0  ;;  %v273_v38 = vmul.f32 %v701_v8, %v701_v8 }
  0x2b   :  { %v125_v25 = vadd.f32 %v124_v51, %v123_v24  ;;  %v274_v59 = vmul.f32 %v723_v15, %v723_v15  ;;  %v290_v60 = vadd.f32 %v289_v63, %v288_v31  ;;  %v275_v36 = vmul.f32 %v728_v17, %v728_v17 }
  0x2c   :  { %v276_v61 = vmul.f32 %v733_v20, %v733_v20  ;;  %v277_v5 = vmul.f32 %v750_v49, %v750_v49  ;;  %v293_v6 = vsel %vm82_vm1, %v225_v56, 0.0  ;;  %v278_v52 = vmul.f32 %v755_v30, %v755_v30 }
  0x2d   :  { %v127_v51 = vadd.f32 %v915_v3, %v125_v25  ;;  %v279_v8 = vmul.f32 %v760_v62, %v760_v62  ;;  %v292_v15 = vadd.f32 %v291_v55, %v290_v60  ;;  %v280_v17 = vmul.f32 %v777_v12, %v777_v12  ;;  %v1396_v25 = vld [vmem:[#allocation51_spill] sm:$0xff] }
  0x2e   :  { %v281_v20 = vmul.f32 %v782_v11, %v782_v11  ;;  %v282_v49 = vmul.f32 %v1392_v0, %v1392_v0  ;;  %v295_v56 = vsel %vm82_vm1, %v226_v1, 0.0  ;;  %v283_v30 = vmul.f32 %v1393_v34, %v1393_v34  ;;  %v1398_v34 = vld [vmem:[#allocation54_spill] sm:$0xff] }
  0x2f   :  { %v129_v3 = vadd.f32 %v931_v50, %v127_v51  ;;  %v294_v35 = vadd.f32 %v293_v6, %v292_v15  ;;  %v297_v62 = vsel %vm82_vm1, %v227_v26, 0.0  ;;  %v299_v9 = vsel %vm82_vm1, %v228_v10, 0.0 }
  0x30   :  { %v301_v12 = vsel %vm82_vm1, %v229_v44, 0.0  ;;  %v303_v14 = vsel %vm82_vm1, %v230_v57, 0.0  ;;  %v305_v11 = vsel %vm82_vm1, %v231_v7, 0.0  ;;  %v307_v1 = vsel %vm82_vm1, %v232_v13, 0.0  ;;  %v1395_v7 = vld [vmem:[#allocation50_spill] sm:$0xff] }
  0x31   :  { %v131_v63 = vadd.f32 %v1394_v41, %v129_v3  ;;  %v296_v24 = vadd.f32 %v295_v56, %v294_v35  ;;  %v1072_v50 = vsel %vm82_vm1, %v253_v18, 0.0  ;;  %v1075_v31 = vsel %vm82_vm1, %v254_v19, 0.0  ;;  %v1397_v56 = vld [vmem:[#allocation35_spill] sm:$0xff] }
  0x32   :  { %v1078_v26 = vsel %vm82_vm1, %v255_v21, 0.0  ;;  %v1081_v44 = vsel %vm82_vm1, %v256_v22, 0.0  ;;  %v1084_v57 = vsel %vm82_vm1, %v257_v23, 0.0  ;;  %v1088_v13 = vsel %vm82_vm1, %v258_v45, 0.0 }
  0x33   :  { %v133_v10 = vadd.f32 %v1395_v7, %v131_v63  ;;  %v298_v55 = vadd.f32 %v297_v62, %v296_v24  ;;  %v1091_v18 = vsel %vm82_vm1, %v259_v4, 0.0  ;;  %v1094_v19 = vsel %vm82_vm1, %v260_v27, 0.0  ;;  %v1399_v62 = vld [vmem:[#allocation36_spill] sm:$0xff] }
  0x34   :  { %v1097_v21 = vsel %vm82_vm1, %v261_v28, 0.0  ;;  %v1100_v22 = vsel %vm82_vm1, %v262_v29, 0.0  ;;  %v1103_v23 = vsel %vm82_vm1, %v263_v33, 0.0  ;;  %v1107_v45 = vsel %vm82_vm1, %v264_v40, 0.0 }
  0x35   :  { %v135_v60 = vadd.f32 %v1396_v25, %v133_v10  ;;  %v300_v6 = vadd.f32 %v299_v9, %v298_v55  ;;  %v1110_v4 = vsel %vm82_vm1, %v265_v42, 0.0  ;;  %v1113_v27 = vsel %vm82_vm1, %v266_v46, 0.0  ;;  %v1401_v10 = vld [vmem:[#allocation38_spill] sm:$0xff] }
  0x36   :  { %v1116_v28 = vsel %vm82_vm1, %v267_v47, 0.0  ;;  %v1119_v29 = vsel %vm82_vm1, %v268_v39, 0.0  ;;  %v1122_v33 = vsel %vm82_vm1, %v269_v48, 0.0  ;;  %v1126_v40 = vsel %vm82_vm1, %v270_v37, 0.0  ;;  %v1402_v25 = vld [vmem:[#allocation2_spill] sm:$0xff] }
  0x37   :  { %v137_v51 = vadd.f32 %v957_v58, %v135_v60  ;;  %v302_v15 = vadd.f32 %v301_v12, %v300_v6  ;;  %v1129_v42 = vsel %vm82_vm1, %v271_v53, 0.0  ;;  %v1132_v46 = vsel %vm82_vm1, %v272_v54, 0.0 }
  0x38   :  { %v1135_v47 = vsel %vm82_vm1, %v273_v38, 0.0  ;;  %v1138_v39 = vsel %vm82_vm1, %v274_v59, 0.0  ;;  %v1141_v48 = vsel %vm82_vm1, %v275_v36, 0.0  ;;  %v1145_v37 = vsel %vm82_vm1, %v276_v61, 0.0 }
  0x39   :  { %v139_v58 = vadd.f32 %v961_v32, %v137_v51  ;;  %v304_v0 = vadd.f32 %v303_v14, %v302_v15  ;;  %v1148_v53 = vsel %vm82_vm1, %v277_v5, 0.0  ;;  %v1151_v54 = vsel %vm82_vm1, %v278_v52, 0.0  ;;  %v1165_v32 = vld [vmem:[%s1318_s0 + $0xf8] sm:$0xff]  ;;  %v1403_v51 = vld [vmem:[#allocation39_spill] sm:$0xff] }
  0x3a   :  { %v1154_v38 = vsel %vm82_vm1, %v279_v8, 0.0  ;;  %v1157_v59 = vsel %vm82_vm1, %v280_v17, 0.0  ;;  %v1160_v36 = vsel %vm82_vm1, %v281_v20, 0.0  ;;  %v1169_v52 = vsel %vm82_vm1, %v282_v49, 0.0 }
  0x3b   :  { %v141_v61 = vadd.f32 %v967_v43, %v139_v58  ;;  %v306_v5 = vadd.f32 %v305_v11, %v304_v0  ;;  %v1172_v8 = vsel %vm82_vm1, %v283_v30, 0.0  ;;  %v144_v17 = vsel %vm82_vm1, %v1165_v32, 0.0  ;;  %v1183_v43 = vld [vmem:[%s1318_s0 + $0x100] sm:$0xff]  ;;  %v1404_v58 = vld [vmem:[#allocation3_spill] sm:$0xff] }
  0x3c   :  { %v235_v20 = vmul.f32 %v1397_v56, %v1397_v56  ;;  %v309_v3 = vsel %vm82_vm1, %v989_v16, 0.0  ;;  %v146_v30 = vsel %vm82_vm1, %v1183_v43, 0.0  ;;  %v236_v9 = vmul.f32 %v1399_v62, %v1399_v62  ;;  %v1400_v16 = vld [vmem:[#allocation37_spill] sm:$0xff] }
  0x3d   :  { %v143_v49 = vadd.f32 %v1398_v34, %v141_v61  ;;  %v308_v35 = vadd.f32 %v307_v1, %v306_v5  ;;  %v311_v12 = vsel %vm82_vm1, %v991_v2, 0.0  ;;  %v237_v41 = vmul.f32 %v1400_v16, %v1400_v16  ;;  %v1405_v5 = vld [vmem:[#allocation40_spill] sm:$0xff]  ;;  %v1408_v62 = vld [vmem:[#allocation5_spill] sm:$0xff] }
  0x3e   :  { %v313_v63 = vsel %vm82_vm1, %v235_v20, 0.0  ;;  %v238_v1 = vmul.f32 %v1401_v10, %v1401_v10  ;;  %v315_v55 = vsel %vm82_vm1, %v236_v9, 0.0  ;;  %v239_v2 = vmul.f32 %v1403_v51, %v1403_v51  ;;  %v1406_v20 = vld [vmem:[#allocation4_spill] sm:$0xff] }
  0x3f   :  { %v145_v14 = vadd.f32 %v144_v17, %v143_v49  ;;  %v310_v11 = vadd.f32 %v309_v3, %v308_v35  ;;  %v317_v15 = vsel %vm82_vm1, %v237_v41, 0.0  ;;  %v240_v17 = vmul.f32 %v1405_v5, %v1405_v5  ;;  %v1407_v49 = vld [vmem:[#allocation41_spill] sm:$0xff]  ;;  %v1410_v41 = vld [vmem:[#allocation6_spill] sm:$0xff] }
  0x40   :  { %v319_v56 = vsel %vm82_vm1, %v238_v1, 0.0  ;;  %v241_v35 = vmul.f32 %v1407_v49, %v1407_v49 }
  0x41   :  { %v147_v24 = vadd.f32 %v146_v30, %v145_v14  ;;  %v312_v7 = vadd.f32 %v311_v12, %v310_v11  ;;  %v321_v30 = vsel %vm82_vm1, %v239_v2, 0.0  ;;  %v1409_v14 = vld [vmem:[#allocation42_spill] sm:$0xff]  ;;  %v323_v16 = vsel %vm82_vm1, %v240_v17, 0.0 }
  0x42   :  { %v242_v11 = vmul.f32 %v1409_v14, %v1409_v14  ;;  %v325_v1 = vsel %vm82_vm1, %v241_v35, 0.0 }
  0x43   :  { %v149_v60 = vadd.f32 %v1402_v25, %v147_v24  ;;  %v314_v6 = vadd.f32 %v313_v63, %v312_v7  ;;  %v1411_v7 = vld [vmem:[#allocation43_spill] sm:$0xff] }
  0x44   :  { %v243_v10 = vmul.f32 %v1411_v7, %v1411_v7  ;;  %v327_v2 = vsel %vm82_vm1, %v242_v11, 0.0 }
  0x45   :  { %v151_v0 = vadd.f32 %v1404_v58, %v149_v60  ;;  %v316_v61 = vadd.f32 %v315_v55, %v314_v6  ;;  %v1412_v55 = vld [vmem:[#allocation7_spill] sm:$0xff]  ;;  %v1413_v6 = vld [vmem:[#allocation44_spill] sm:$0xff] }
  0x46   :  { %v244_v51 = vmul.f32 %v1413_v6, %v1413_v6  ;;  %v329_v17 = vsel %vm82_vm1, %v243_v10, 0.0 }
  0x47   :  { %v153_v3 = vadd.f32 %v1406_v20, %v151_v0  ;;  %v318_v34 = vadd.f32 %v317_v15, %v316_v61  ;;  %v1414_v15 = vld [vmem:[#allocation8_spill] sm:$0xff]  ;;  %v1415_v61 = vld [vmem:[#allocation45_spill] sm:$0xff] }
  0x48   :  { %v245_v5 = vmul.f32 %v1415_v61, %v1415_v61  ;;  %v331_v35 = vsel %vm82_vm1, %v244_v51, 0.0 }
  0x49   :  { %v155_v9 = vadd.f32 %v1408_v62, %v153_v3  ;;  %v320_v12 = vadd.f32 %v319_v56, %v318_v34  ;;  %v1416_v56 = vld [vmem:[#allocation9_spill] sm:$0xff]  ;;  %v1417_v34 = vld [vmem:[#allocation46_spill] sm:$0xff] }
  0x4a   :  { %v246_v49 = vmul.f32 %v1417_v34, %v1417_v34  ;;  %v333_v11 = vsel %vm82_vm1, %v245_v5, 0.0 }
  0x4b   :  { %v157_v63 = vadd.f32 %v1410_v41, %v155_v9  ;;  %v322_v24 = vadd.f32 %v321_v30, %v320_v12  ;;  %v1418_v30 = vld [vmem:[#allocation10_spill] sm:$0xff]  ;;  %v1419_v12 = vld [vmem:[#allocation47_spill] sm:$0xff] }
  0x4c   :  { %v247_v14 = vmul.f32 %v1419_v12, %v1419_v12  ;;  %v335_v10 = vsel %vm82_vm1, %v246_v49, 0.0  ;;  %v1427_v49 = vld [vmem:[#allocation15_spill] sm:$0xff]  ;;  %v1428_v12 = vld [vmem:[#allocation16_spill] sm:$0xff] }
  0x4d   :  { %v159_v25 = vadd.f32 %v1412_v55, %v157_v63  ;;  %v324_v60 = vadd.f32 %v323_v16, %v322_v24  ;;  %v1420_v16 = vld [vmem:[#allocation11_spill] sm:$0xff]  ;;  %v1421_v24 = vld [vmem:[#allocation48_spill] sm:$0xff] }
  0x4e   :  { %v248_v7 = vmul.f32 %v1421_v24, %v1421_v24  ;;  %v337_v51 = vsel %vm82_vm1, %v247_v14, 0.0 }
  0x4f   :  { %v161_v58 = vadd.f32 %v1414_v15, %v159_v25  ;;  %v326_v0 = vadd.f32 %v325_v1, %v324_v60  ;;  %v1422_v1 = vld [vmem:[#allocation12_spill] sm:$0xff] }
  0x50   :  { %v1423_v60 = vld [vmem:[#allocation52_spill] sm:$0xff]  ;;  %v339_v5 = vsel %vm82_vm1, %v248_v7, 0.0  ;;  %v1430_v7 = vld [vmem:[#allocation18_spill] sm:$0xff] }
  0x51   :  { %v163_v20 = vadd.f32 %v1416_v56, %v161_v58  ;;  %v328_v3 = vadd.f32 %v327_v2, %v326_v0  ;;  %v249_v6 = vmul.f32 %v1423_v60, %v1423_v60  ;;  %v1424_v2 = vld [vmem:[#allocation13_spill] sm:$0xff] }
  0x52   :  { %v1425_v0 = vld [vmem:[#allocation53_spill] sm:$0xff] }
  0x53   :  { %v165_v62 = vadd.f32 %v1418_v30, %v163_v20  ;;  %v330_v9 = vadd.f32 %v329_v17, %v328_v3  ;;  %v250_v61 = vmul.f32 %v1425_v0, %v1425_v0  ;;  %v1426_v17 = vld [vmem:[#allocation14_spill] sm:$0xff]  ;;  %v251_v3 = vmul.f32 %v1165_v32, %v1165_v32 }
  0x54   :  { %v341_v34 = vsel %vm82_vm1, %v249_v6, 0.0  ;;  %v1432_v6 = vld [vmem:[#allocation20_spill] sm:$0xff]  ;;  %v1434_v0 = vld [vmem:[#allocation22_spill] sm:$0xff] }
  0x55   :  { %v167_v41 = vadd.f32 %v1420_v16, %v165_v62  ;;  %v332_v63 = vadd.f32 %v331_v35, %v330_v9  ;;  %v252_v62 = vmul.f32 %v1183_v43, %v1183_v43  ;;  %v343_v9 = vsel %vm82_vm1, %v250_v61, 0.0 }
  0x56   :  { %v345_v16 = vsel %vm82_vm1, %v251_v3, 0.0  ;;  %v1436_v3 = vld [vmem:[#allocation24_spill] sm:$0xff] }
  0x57   :  { %v169_v55 = vadd.f32 %v1422_v1, %v167_v41  ;;  %v334_v25 = vadd.f32 %v333_v11, %v332_v63  ;;  %v1429_v41 = vld [vmem:[#allocation17_spill] sm:$0xff]  ;;  %v347_v32 = vsel %vm82_vm1, %v252_v62, 0.0  ;;  %v1438_v62 = vld [vmem:[#allocation27_spill] sm:$0xff] }
  0x59   :  { %v171_v15 = vadd.f32 %v1424_v2, %v169_v55  ;;  %v336_v58 = vadd.f32 %v335_v10, %v334_v25  ;;  %v1431_v55 = vld [vmem:[#allocation19_spill] sm:$0xff]  ;;  %v1433_v2 = vld [vmem:[#allocation21_spill] sm:$0xff] }
  0x5b   :  { %v173_v56 = vadd.f32 %v1426_v17, %v171_v15  ;;  %v338_v20 = vadd.f32 %v337_v51, %v336_v58  ;;  %v1435_v17 = vld [vmem:[#allocation23_spill] sm:$0xff] }
  0x5d   :  { %v175_v35 = vadd.f32 %v1427_v49, %v173_v56  ;;  %v340_v30 = vadd.f32 %v339_v5, %v338_v20 }
  0x5f   :  { %v177_v14 = vadd.f32 %v1428_v12, %v175_v35  ;;  %v342_v11 = vadd.f32 %v341_v34, %v340_v30  ;;  %v1437_v35 = vld [vmem:[#allocation25_spill] sm:$0xff]  ;;  %v1439_v12 = vld [vmem:[#allocation28_spill] sm:$0xff] }
  0x61   :  { %v179_v63 = vadd.f32 %v1429_v41, %v177_v14  ;;  %v344_v24 = vadd.f32 %v343_v9, %v342_v11  ;;  %v1440_v11 = vld [vmem:[#allocation29_spill] sm:$0xff]  ;;  %v1441_v41 = vld [vmem:[#allocation31_spill] sm:$0xff] }
  0x63   :  { %v181_v10 = vadd.f32 %v1430_v7, %v179_v63  ;;  %v346_v1 = vadd.f32 %v345_v16, %v344_v24  ;;  %v1442_v24 = vld [vmem:[#allocation32_spill] sm:$0xff]  ;;  %v1443_v7 = vld [vmem:[#allocation33_spill] sm:$0xff] }
  0x65   :  { %v183_v25 = vadd.f32 %v1431_v55, %v181_v10  ;;  %v348_v60 = vadd.f32 %v347_v32, %v346_v1  ;;  %v1444_v1 = vld [vmem:[#allocation34_spill] sm:$0xff] }
  0x67   :  { %v185_v43 = vadd.f32 %v1432_v6, %v183_v25  ;;  %v350_v51 = vadd.f32 %v1072_v50, %v348_v60 }
  0x69   :  { %v187_v15 = vadd.f32 %v1433_v2, %v185_v43  ;;  %v352_v58 = vadd.f32 %v1075_v31, %v350_v51 }
  0x6b   :  { %v189_v61 = vadd.f32 %v1434_v0, %v187_v15  ;;  %v354_v5 = vadd.f32 %v1078_v26, %v352_v58 }
  0x6d   :  { %v191_v56 = vadd.f32 %v1435_v17, %v189_v61  ;;  %v356_v20 = vadd.f32 %v1081_v44, %v354_v5 }
  0x6f   :  { %v193_v34 = vadd.f32 %v1436_v3, %v191_v56  ;;  %v358_v49 = vadd.f32 %v1084_v57, %v356_v20 }
  0x71   :  { %v195_v30 = vadd.f32 %v1437_v35, %v193_v34  ;;  %v360_v50 = vadd.f32 %v1088_v13, %v358_v49 }
  0x73   :  { %v197_v9 = vadd.f32 %v1438_v62, %v195_v30  ;;  %v362_v31 = vadd.f32 %v1091_v18, %v360_v50 }
  0x75   :  { %v199_v14 = vadd.f32 %v1439_v12, %v197_v9  ;;  %v364_v26 = vadd.f32 %v1094_v19, %v362_v31 }
  0x77   :  { %v201_v16 = vadd.f32 %v1440_v11, %v199_v14  ;;  %v366_v44 = vadd.f32 %v1097_v21, %v364_v26 }
  0x79   :  { %v203_v63 = vadd.f32 %v1441_v41, %v201_v16  ;;  %v368_v57 = vadd.f32 %v1100_v22, %v366_v44 }
  0x7b   :  { %v205_v32 = vadd.f32 %v1442_v24, %v203_v63  ;;  %v370_v13 = vadd.f32 %v1103_v23, %v368_v57 }
  0x7d   :  { %v207_v10 = vadd.f32 %v1443_v7, %v205_v32  ;;  %v372_v18 = vadd.f32 %v1107_v45, %v370_v13  ;;  %v81_v45 = vld [vmem:[%s1319_s1] sm:$0x1] }
  0x7f   :  { %v209_v55 = vadd.f32 %v1444_v1, %v207_v10  ;;  %v374_v19 = vadd.f32 %v1110_v4, %v372_v18 }
  0x81   :  { %v210_v25 = vrot.slane %v209_v55, 4  ;;  %v376_v60 = vadd.f32 %v1113_v27, %v374_v19 }
  0x83   :  { %v211_v21 = vadd.f32 %v210_v25, %v209_v55  ;;  %v378_v6 = vadd.f32 %v1116_v28, %v376_v60 }
  0x85   :  { %v212_v43 = vrot.slane %v211_v21, 2  ;;  %v380_v22 = vadd.f32 %v1119_v29, %v378_v6 }
  0x87   :  { %v213_v51 = vadd.f32 %v212_v43, %v211_v21  ;;  %v382_v23 = vadd.f32 %v1122_v33, %v380_v22 }
  0x89   :  { %v214_v2 = vrot.slane %v213_v51, 1  ;;  %v384_v15 = vadd.f32 %v1126_v40, %v382_v23 }
  0x8b   :  { %v215_v4 = vadd.f32 %v214_v2, %v213_v51  ;;  %v386_v58 = vadd.f32 %v1129_v42, %v384_v15 }
  0x8d   :  { %v216_v27 = vadd.f32 %v215_v4, %v81_v45  ;;  %v388_v0 = vadd.f32 %v1132_v46, %v386_v58 }
  0x8f   :  { %218 = vst.msk [vmem:[%s1319_s1] sm:$0x1] %vm14_vm0, %v216_v27  ;;  %v390_v28 = vadd.f32 %v1135_v47, %v388_v0 }
  0x91   :  { %v392_v29 = vadd.f32 %v1138_v39, %v390_v28 }
  0x93   :  { %v394_v33 = vadd.f32 %v1141_v48, %v392_v29 }
  0x95   :  { %v396_v40 = vadd.f32 %v1145_v37, %v394_v33  ;;  %v219_v37 = vld [vmem:[%s1320_s2] sm:$0x1] }
  0x97   :  { %v398_v61 = vadd.f32 %v1148_v53, %v396_v40 }
  0x99   :  { %v400_v42 = vadd.f32 %v1151_v54, %v398_v61 }
  0x9b   :  { %v402_v5 = vadd.f32 %v1154_v38, %v400_v42 }
  0x9d   :  { %v404_v46 = vadd.f32 %v1157_v59, %v402_v5 }
  0x9f   :  { %v406_v17 = vadd.f32 %v1160_v36, %v404_v46 }
  0xa1   :  { %v408_v56 = vadd.f32 %v1169_v52, %v406_v17 }
  0xa3   :  { %v410_v47 = vadd.f32 %v1172_v8, %v408_v56 }
  0xa5   :  { %v411_v20 = vrot.slane %v410_v47, 4 }
  0xa7   :  { %v412_v39 = vadd.f32 %v411_v20, %v410_v47 }
  0xa9   :  { %v413_v3 = vrot.slane %v412_v39, 2 }
  0xab   :  { %v414_v48 = vadd.f32 %v413_v3, %v412_v39 }
  0xad   :  { %v415_v34 = vrot.slane %v414_v48, 1 }
  0xaf   :  { %v416_v53 = vadd.f32 %v415_v34, %v414_v48 }
  0xb1   :  { %v417_v54 = vadd.f32 %v416_v53, %v219_v37 }
  0xb3   :  { %418 = vst.msk [vmem:[%s1320_s2] sm:$0x1] %vm14_vm0, %v417_v54 }

</bundles_post_ra>
